<compile_context>
chip_gen: v6e
topology: v6e:2x2x1
jax: 0.10.0
libtpu: 0.0.40
codegen_flags: <defaults>
</compile_context>

<pallas_src>
import functools

import numpy as np
import jax
import jax.numpy as jnp
from jax import lax
from jax.experimental import pallas as pl
from jax.experimental.pallas import tpu as pltpu

H_FIXED = 112   # hardcoded spatial size in the PyTorch module (H == W == 112)


def _permute_kernel(x_ref, p_ref, o_ref, xt_ref, *, precision):
    # x_ref : (Bt, C*H, W)   rows ordered c*H + h, minor dim W
    # p_ref : (C*H, H*C)     one-hot interleave matrix (constant block, resident)
    # o_ref : (Bt, W, H*C)   lane-dense output block (448 lanes for C = 4)
    # xt_ref: (Bt*W, C*H)    VMEM scratch holding the per-batch transposes
    bt, _, w = x_ref.shape

    # Per-batch 2-D XLU transposes into a single (Bt*W, C*H) slab.
    # Static, sublane-aligned slices (W = 112 is a multiple of 8).
    for b in range(bt):
        xt_ref[b * w:(b + 1) * w, :] = x_ref[b].T

    # One collapsed MXU matmul: (Bt*W, C*H) @ (C*H, H*C) -> (Bt*W, H*C), f32 acc.
    acc = jnp.dot(
        xt_ref[...], p_ref[...],
        precision=precision,                 # HIGHEST only for f32 inputs
        preferred_element_type=jnp.float32,
    )

    # Dense stores, one batch row-slab at a time (static slices).
    for b in range(bt):
        o_ref[b] = acc[b * w:(b + 1) * w, :].astype(o_ref.dtype)


@functools.lru_cache(maxsize=None)
def _interleave_matrix(C, H, dtype_name):
    # Host-built compile-time constant: P[c*H + h, h*C + c] = 1.
    i = np.arange(C * H)
    dest = (i % H) * C + (i // H)
    p = np.zeros((C * H, H * C), dtype=np.float32)
    p[i, dest] = 1.0
    return jnp.asarray(p, dtype=jnp.dtype(dtype_name))


def _pick_block_batch(B, C, H, W, itemsize):
    # Double-buffered in + out blocks per batch element, plus (worst case
    # double-buffered) P, must stay under a conservative 24 MiB budget
    # (< 32 MiB default scoped VMEM on all generations, incl. v7x).
    per_batch = 2 * (C * H * W + W * H * C) * itemsize
    p_bytes = 2 * (C * H) * (H * C) * itemsize
    budget = 24 * 1024 * 1024 - p_bytes
    cap = int(max(1, min(32, budget // max(per_batch, 1))))
    if B >= 2:
        cap = min(cap, B // 2)   # keep >= 2 grid steps so both v7x TCs get work
    bt = 1
    for d in range(1, min(cap, B) + 1):
        if B % d == 0:           # largest divisor of B not exceeding the cap
            bt = d
    return bt


def permute_forward(x, dim):
    # --- glue: pure reshapes, no data movement ---
    # torch.flatten(x, start_dim=3, end_dim=-1)
    x4 = x.reshape(x.shape[0], x.shape[1], x.shape[2], -1)
    # x.reshape([-1, dim, 112, 112])
    x4 = x4.reshape(-1, dim, H_FIXED, H_FIXED)
    B, C, H, W = x4.shape

    if not jnp.issubdtype(x4.dtype, jnp.floating):
        # TODO(synk): integer dtypes need a non-MXU relayout path; fall back to XLA.
        return jnp.transpose(x4, (0, 3, 2, 1))

    # f32: HIGHEST keeps the one-hot contraction exact (x split into bf16 passes).
    precision = lax.Precision.HIGHEST if x4.dtype == jnp.float32 else None

    # Kernel-friendly 3-D view: rows are (c*H + h), minor dim is W (free view).
    x2 = x4.reshape(B, C * H, W)
    perm = _interleave_matrix(C, H, jnp.dtype(x4.dtype).name)

    itemsize = jnp.dtype(x4.dtype).itemsize
    bt = _pick_block_batch(B, C, H, W, itemsize)
    grid_b = B // bt

    kernel = functools.partial(_permute_kernel, precision=precision)

    out = pl.pallas_call(
        kernel,
        out_shape=jax.ShapeDtypeStruct((B, W, H * C), x4.dtype),
        grid_spec=pltpu.PrefetchScalarGridSpec(
            num_scalar_prefetch=0,
            grid=(grid_b,),
            in_specs=[
                # (Bt, C*H, W): sublane dim 448 (mult. of 8), lane dim W = full dim.
                pl.BlockSpec((bt, C * H, W), lambda b: (b, 0, 0)),
                # Constant index map -> DMA'd once per core, stays resident in VMEM.
                pl.BlockSpec((C * H, H * C), lambda b: (0, 0)),
            ],
            # Lane-dense output block: last dim H*C = 448 (full dim) -> dense vst.
            out_specs=pl.BlockSpec((bt, W, H * C), lambda b: (b, 0, 0)),
            scratch_shapes=[pltpu.VMEM((bt * W, C * H), x4.dtype)],
        ),
        compiler_params=pltpu.CompilerParams(
            # Batch axis is parallel: with >= 2 grid steps both v7x TCs get work.
            dimension_semantics=("parallel",)),
        cost_estimate=pl.CostEstimate(
            flops=2 * B * W * (C * H) * (H * C),
            transcendentals=0,
            bytes_accessed=(2 * B * C * H * W + (C * H) * (H * C)) * itemsize),
    )(x2, perm)

    # Free reshape back to the PyTorch output layout (B, W, H, C).
    return out.reshape(B, W, H, C)


if __name__ == "__main__":
    key = jax.random.PRNGKey(0)
    dim = 4
    # Trailing dims (56, 2) exercise flatten(start_dim=3); each batch element has
    # dim*112*112 elements so the hardcoded reshape works.  B = 4 makes the
    # wrapper pick Bt = 2 (exercises the multi-batch block + collapsed matmul)
    # while keeping 2 "parallel" grid steps.  bf16 is the MXU-native dtype and
    # makes the one-hot contraction bit-exact.
    x = jax.random.normal(key, (4, dim, H_FIXED, 56, 2), dtype=jnp.bfloat16)

    out = jax.block_until_ready(permute_forward(x, dim))

    # Pure-JAX reference of the PyTorch semantics.
    ref = x.reshape(x.shape[0], x.shape[1], x.shape[2], -1)
    ref = ref.reshape(-1, dim, H_FIXED, H_FIXED)
    ref = jnp.transpose(ref, (0, 3, 2, 1))

    assert out.shape == ref.shape == (4, H_FIXED, H_FIXED, dim), out.shape
    assert out.dtype == x.dtype
    # Pure relayout -> bit-exact (values multiplied by 1.0, accumulated in f32).
    assert jnp.array_equal(out, ref), "mismatch vs reference permute"
    print("KERNEL_OK")
</pallas_src>

<mosaic_0001>
module attributes {stable_mosaic.version = 11 : i64} {
  func.func @_permute_kernel(%arg0: i32, %arg1: memref<2x448x112xbf16, #tpu.memory_space<vmem>>, %arg2: memref<448x448xbf16, #tpu.memory_space<vmem>>, %arg3: memref<2x112x448xbf16, #tpu.memory_space<vmem>>, %arg4: memref<224x448xbf16, #tpu.memory_space<vmem>>) attributes {dimension_semantics = [#tpu.dimension_semantics<parallel>], iteration_bounds = array<i64: 2>, scalar_prefetch = 0 : i64, scratch_operands = 1 : i64, tpu.core_type = #tpu.core_type<tc>, window_params = [{transform_indices = @transform_0, window_bounds = array<i64: 2, 448, 112>}, {pipeline_mode = #tpu.pipeline_mode<synchronous>, transform_indices = @transform_1, window_bounds = array<i64: 448, 448>}, {transform_indices = @transform_2, window_bounds = array<i64: 2, 112, 448>}]} {
    %c0 = arith.constant 0 : index
    %c0_0 = arith.constant 0 : index
    %c0_1 = arith.constant 0 : index
    %0 = vector.load %arg1[%c0, %c0_0, %c0_1] : memref<2x448x112xbf16, #tpu.memory_space<vmem>>, vector<1x448x112xbf16>
    %1 = vector.shape_cast %0 : vector<1x448x112xbf16> to vector<448x112xbf16>
    %2 = tpu.transpose %1, [1, 0] : vector<448x112xbf16> -> vector<112x448xbf16>
    %c0_2 = arith.constant 0 : index
    %c0_3 = arith.constant 0 : index
    %3 = vector.load %arg4[%c0_2, %c0_3] : memref<224x448xbf16, #tpu.memory_space<vmem>>, vector<112x448xbf16>
    tpu.vector_store %arg4[%c0_2, %c0_3], %2 {strides = array<i32>} : memref<224x448xbf16, #tpu.memory_space<vmem>>, vector<112x448xbf16>,
    %c1 = arith.constant 1 : index
    %c0_4 = arith.constant 0 : index
    %c0_5 = arith.constant 0 : index
    %4 = vector.load %arg1[%c1, %c0_4, %c0_5] : memref<2x448x112xbf16, #tpu.memory_space<vmem>>, vector<1x448x112xbf16>
    %5 = vector.shape_cast %4 : vector<1x448x112xbf16> to vector<448x112xbf16>
    %6 = tpu.transpose %5, [1, 0] : vector<448x112xbf16> -> vector<112x448xbf16>
    %c112 = arith.constant 112 : index
    %c0_6 = arith.constant 0 : index
    %7 = vector.load %arg4[%c112, %c0_6] : memref<224x448xbf16, #tpu.memory_space<vmem>>, vector<112x448xbf16>
    tpu.vector_store %arg4[%c112, %c0_6], %6 {strides = array<i32>} : memref<224x448xbf16, #tpu.memory_space<vmem>>, vector<112x448xbf16>,
    %c0_7 = arith.constant 0 : index
    %c0_8 = arith.constant 0 : index
    %8 = vector.load %arg4[%c0_7, %c0_8] : memref<224x448xbf16, #tpu.memory_space<vmem>>, vector<224x448xbf16>
    %c0_9 = arith.constant 0 : index
    %c0_10 = arith.constant 0 : index
    %9 = vector.load %arg2[%c0_9, %c0_10] : memref<448x448xbf16, #tpu.memory_space<vmem>>, vector<448x448xbf16>
    %cst = arith.constant dense<0.000000e+00> : vector<224x448xf32>
    %10 = tpu.matmul %8, %9, %cst {dimension_numbers = #tpu.dot_dimension_numbers<[1], [0], [0], [1], [0, 0, 1, 1], [], []>} : vector<224x448xbf16>, vector<448x448xbf16>, vector<224x448xf32> -> vector<224x448xf32>
    %11 = vector.extract_strided_slice %10 {offsets = [0, 0], sizes = [112, 448], strides = [1, 1]} : vector<224x448xf32> to vector<112x448xf32>
    %12 = arith.truncf %11 : vector<112x448xf32> to vector<112x448xbf16>
    %c0_11 = arith.constant 0 : index
    %c0_12 = arith.constant 0 : index
    %c0_13 = arith.constant 0 : index
    %13 = vector.load %arg3[%c0_11, %c0_12, %c0_13] : memref<2x112x448xbf16, #tpu.memory_space<vmem>>, vector<1x112x448xbf16>
    %14 = vector.shape_cast %13 : vector<1x112x448xbf16> to vector<112x448xbf16>
    %15 = vector.shape_cast %12 : vector<112x448xbf16> to vector<1x112x448xbf16>
    tpu.vector_store %arg3[%c0_11, %c0_12, %c0_13], %15 {strides = array<i32>} : memref<2x112x448xbf16, #tpu.memory_space<vmem>>, vector<1x112x448xbf16>,
    %16 = vector.extract_strided_slice %10 {offsets = [112, 0], sizes = [112, 448], strides = [1, 1]} : vector<224x448xf32> to vector<112x448xf32>
    %17 = arith.truncf %16 : vector<112x448xf32> to vector<112x448xbf16>
    %c1_14 = arith.constant 1 : index
    %c0_15 = arith.constant 0 : index
    %c0_16 = arith.constant 0 : index
    %18 = vector.load %arg3[%c1_14, %c0_15, %c0_16] : memref<2x112x448xbf16, #tpu.memory_space<vmem>>, vector<1x112x448xbf16>
    %19 = vector.shape_cast %18 : vector<1x112x448xbf16> to vector<112x448xbf16>
    %20 = vector.shape_cast %17 : vector<112x448xbf16> to vector<1x112x448xbf16>
    tpu.vector_store %arg3[%c1_14, %c0_15, %c0_16], %20 {strides = array<i32>} : memref<2x112x448xbf16, #tpu.memory_space<vmem>>, vector<1x112x448xbf16>,
    return
  }
  func.func @transform_0(%arg0: i32) -> (i32, i32, i32) {
    %c0_i32 = arith.constant 0 : i32
    %c0_i32_0 = arith.constant 0 : i32
    %c0_i32_1 = arith.constant 0 : i32
    return %arg0, %c0_i32, %c0_i32_0 : i32, i32, i32
  }
  func.func @transform_1(%arg0: i32) -> (i32, i32) {
    %c0_i32 = arith.constant 0 : i32
    %c0_i32_0 = arith.constant 0 : i32
    %c0_i32_1 = arith.constant 0 : i32
    return %c0_i32, %c0_i32_0 : i32, i32
  }
  func.func @transform_2(%arg0: i32) -> (i32, i32, i32) {
    %c0_i32 = arith.constant 0 : i32
    %c0_i32_0 = arith.constant 0 : i32
    %c0_i32_1 = arith.constant 0 : i32
    return %arg0, %c0_i32, %c0_i32_0 : i32, i32, i32
  }
}

</mosaic_0001>

<bundles_post_ra>
// kernel: tpu_custom_call.1
= control target key start
LH: loop header
LB: loop body
LE: loop exit
PB: predicated region body
PF: predicated region fallthrough
CT: control target
= control target key end

     0   :  { %7 = vsyncpa [#allocation4], 0  ;;  %s5101_s0 = inlined_call_operand.hbm [shape: bf16[4,448,112], index: 0, kind: input, shape index: {}]   ;;  %s5102_s1 = inlined_call_operand.hbm [shape: bf16[448,448], index: 1, kind: input, shape index: {}]   ;;  %s5103_s2 = inlined_call_operand.hbm [shape: bf16[4,112,448], index: 2, kind: output, shape index: {}]  }
   0x1   :  { %9 = vsyncpa [#allocation4 + $0x1], 0 }
   0x2   :  { %10 = vsyncpa [#allocation7], 0 }
   0x3   :  { %11 = vsyncpa [#allocation5], 0 }
   0x4   :  { %13 = vsyncpa [#allocation5 + $0x1], 0  ;;  %s4339_s9 = smov 0   ;;  %s4341_s10 = smov 0  }
   0x5   :  { %s4343_s11 = smov 0   ;;  %s4345_s12 = smov 0  }
   0x6 LB: > { %s4360_s13 = sadd.s32 4294967295, %s4313_s12   ;;  %s3317_s14 = sadd.s32 4294967294, %s4313_s12   ;;  %s4313_s12 = sphi %s4345_s12, %s5176_s12   ;;  %s4309_s11 = sphi %s4343_s11, %s5175_s11   ;;  %s4305_s10 = sphi %s4341_s10, %s5174_s10   ;;  %s4301_s9 = sphi %s4339_s9, %s5173_s9  }
   0x7   : > { %p39_p0 = scmp.ne.s32.totalorder %s4305_s10, %s4301_s9  ;;  %p5104_p1 = scmp.eq.s32.totalorder %s4360_s13, 0 }
   0x8   : > { %p90_p3 = scmp.eq.s32.totalorder %s3317_s14, 1  ;;  %p3318_p5 = scmp.ge.s32.totalorder %s4313_s12, 1 }
   0x9   : > { %p4369_p4 = por %p5104_p1, %p39_p0  ;;  %p97_p7 = scmp.lt.s32.totalorder %s4313_s12, 3 }
   0xa   : > { %p4374_p6 = por %p90_p3, %p39_p0  ;;  %s4315_s18 = smov [#allocation6]  }
   0xb   : > { %s5125_s15 = scalar_select %p4369_p4, 1, 0 }
   0xc   : > { %s5126_s16 = scalar_select %p4374_p6, 1, 0 }
   0xd   : > { %p4379_p8 = pnand %p3318_p5, %p97_p7  ;;  %s109_s19 = sshll.u32 %s4315_s18, 4  ;;  %s110_s19 = int_to_ptr.vmem [resolvable:$true] %s109_s19 }
   0xe   : > { %s4393_s21 = sadd.s32 1, %s4313_s12   ;;  %s26_s22 = sadd.s32 1, %s4309_s11 }
   0xf   : > { %s5127_s17 = scalar_select %p4379_p8, 1, 0 }
  0x10   : > { %p3871_p9 = pneg %p4379_p8  ;;  %s23_s23 = ssub.s32 %s4313_s12, %s4393_s21 }
  0x11   : > { %s4202_s24 = scalar_lea.vmem %s110_s19, 14336  ;;  %p4210_p5 = scmp.lt.s32.totalorder %s110_s19, %s110_s19 }
  0x12   : > { %p4388_p11 = pnand %p3871_p9, %p5104_p1  ;;  %p4203_p13 = scmp.ne.s32.totalorder %s110_s19, %s4202_s24 }
  0x13   : > { %p4211_p7 = scmp.lt.s32.totalorder %s4202_s24, %s4202_s24 }
  0x14   : > { %p4193_p12 = pneg %p4388_p11 }
  0x15   : > { %p4212_p10 = por %p4211_p7, %p4210_p5 }
  0x16   : > { %p4205_p0 = pnand %p4203_p13, %p4193_p12 }
  0x18   : > { %p4206_p3 = pneg %p4205_p0 }
  0x1a   : > { %p4213_p2 = pnand %p4212_p10, %p4206_p3 }
  0x1c   : > { %4216 = shalt.err (!%p4213_p2)
}
  0x1d   : > { %s4316_s25 = smov 256   ;;  %s4317_s26 = smov 16  }
  0x1e   : > { %3874 = dma.hbm_to_vmem [thread:$0]  (!%p4388_p11), %s5102_s1, 14336, %s110_s19, [#allocation7], %s4316_s25, %s4316_s25, %s4317_s26  }
  0x1f   : > { %p24_p9 = scmp.eq.s32.totalorder %s23_s23, 0  ;;  %p33_p12 = scmp.ne.s32.totalorder %s4309_s11, %s4305_s10 }
  0x20   : > { %p34_p10 = scmp.eq.s32.totalorder %s4313_s12, 0  ;;  %p3884_p2 = scmp.lt.s32.totalorder %s4313_s12, 2 }
  0x21   : > { %s4410_s29 = scalar_select %p24_p9, %s4309_s11, %s26_s22  }
  0x22   : > { %p35_p13 = por %p34_p10, %p33_p12  ;;  %p5129_p0 = scmp.eq.s32.totalorder %s4360_s13, 1 }
  0x23   : > { %s123_s3 = sand.u32 1, %s4309_s11   ;;  %s3860_s4 = smul.u32 7168, %s4313_s12 }
  0x24   : > { %p4414_p3 = por %p5129_p0, %p33_p12  ;;  %s3859_s5 = smul.u32 448, %s123_s3 }
  0x25   : > { %s4423_s8 = scalar_lea.hbm %s5101_s0, %s3860_s4  ;;  %p4425_p11 = pnand %p3884_p2, %p35_p13 }
  0x26   : > { %s5130_s30 = scalar_select %p4414_p3, 1, 0 }
  0x27   : > { %s127_s18 = scalar_lea.vmem [#allocation3], %s3859_s5  ;;  %s4431_s20 = scalar_lea.sflag [#allocation4], %s123_s3 }
  0x28   : > { %s135_s19 = sshll.u32 %s127_s18, 4  ;;  %s4217_s22 = scalar_lea.hbm %s4423_s8, 7168  ;;  %s4429_s19 = int_to_ptr.vmem [resolvable:$true] %s135_s19 }
  0x29   : > { %p4218_p5 = scmp.ne.s32.totalorder %s4423_s8, %s4217_s22  ;;  %p4219_p7 = pneg %p4425_p11 }
  0x2a   : > { %s4222_s25 = scalar_lea.hbm %s5101_s0, 14336  ;;  %p4223_p10 = scmp.lt.s32.totalorder %s4423_s8, %s5101_s0 }
  0x2b   : > { %p4220_p9 = pnand %p4219_p7, %p4218_p5  ;;  %p4224_p2 = scmp.lt.s32.totalorder %s4222_s25, %s4217_s22 }
  0x2d   : > { %p4221_p12 = pneg %p4220_p9  ;;  %p4225_p13 = por %p4224_p2, %p4223_p10 }
  0x2f   : > { %p4226_p0 = pnand %p4225_p13, %p4221_p12 }
  0x31   : > { %4229 = shalt.err (!%p4226_p0)
}
  0x32   : > { %s4230_s28 = scalar_lea.vmem %s4429_s19, 7168  ;;  %s4318_s3 = smov [#allocation3]  }
  0x33   : > { %p4231_p1 = scmp.ne.s32.totalorder %s4429_s19, %s4230_s28  ;;  %s4235_s4 = sshll.u32 %s4318_s3, 4  ;;  %s4236_s4 = int_to_ptr.vmem [resolvable:$false] %s4235_s4 }
  0x34   : > { %s4237_s5 = scalar_lea.vmem %s4236_s4, 14336  ;;  %p4238_p9 = scmp.lt.s32.totalorder %s4429_s19, %s4236_s4 }
  0x35   : > { %p4233_p6 = pnand %p4231_p1, %p4219_p7  ;;  %p4239_p3 = scmp.lt.s32.totalorder %s4237_s5, %s4230_s28 }
  0x37   : > { %p4234_p5 = pneg %p4233_p6  ;;  %p4240_p4 = por %p4239_p3, %p4238_p9 }
  0x39   : > { %p4241_p8 = pnand %p4240_p4, %p4234_p5 }
  0x3b   : > { %4244 = shalt.err (!%p4241_p8)
}
  0x3c   : > { %s4319_s6 = smov 64   ;;  %s4320_s7 = smov 4  }
  0x3d   : > { %3878 = dma.hbm_to_vmem [thread:$0]  (!%p4425_p11), %s4423_s8, 7168, %s4429_s19, %s4431_s20, %s4319_s6, %s4319_s6, %s4320_s7  }
  0x3e   : > { %p5132_p1 = scmp.ne.s32.totalorder %s5127_s17, 0 }
  0x40   : > { %147 = sbr.rel (%p5132_p1) target bundleno = 640 (0x280), region = 28 }
  0x45   : > { %s4455_s18 = sand.u32 1, %s4305_s10   ;;  %p5133_p4 = scmp.ne.s32.totalorder %s5125_s15, 0 }
  0x46   : > { %s3861_s22 = smul.u32 448, %s4455_s18  ;;  %s150_s23 = scalar_lea.sflag [#allocation4], %s4455_s18 }
  0x48   : > { %s4461_s24 = scalar_lea.vmem [#allocation3], %s3861_s22 }
  0x49   : > { %4288 = dma.done.wait (%p5133_p4), %s150_s23, 7168  }
  0x4a   : > { %4290 = vsyncadd (%p5133_p4), %s150_s23, 4294960128  ;;  %p5134_p6 = scmp.eq.s32.totalorder %s4360_s13, 0 }
  0x4c   : > { %4292 = dma.done.wait (%p5134_p6), [#allocation7], 14336   ;;  %p5135_p8 = pmov %p5134_p6 }
  0x4d   : > { %v3927_v0 = vld [vmem:[%s4461_s24 + $0xc0] sm:$0xff]   ;;  %v3929_v2 = vld [vmem:[%s4461_s24 + $0xc8] sm:$0xff]   ;;  %v3931_v4 = vld [vmem:[%s4461_s24 + $0xd0] sm:$0xff]   ;;  %vm610_vm0 = vcmask 1043456   ;;  %vm611_vm1 = vcmask 523268   ;;  %vm2091_vm3 = vcmask 523264  }
  0x4e   : > { %4294 = vsyncadd (%p5135_p8), [#allocation7], 4294952960  ;;  %v3928_v1 = vld [vmem:[%s4461_s24 + $0x80] sm:$0xff]   ;;  %453 = vxpose.xlu1.c.b16.start [1/4] (short) (narrow) %v3927_v0, 112  ;;  %v3930_v3 = vld [vmem:[%s4461_s24 + $0x88] sm:$0xff]   ;;  %s4930_s15 = scalar_lea.vmem [#allocation8], %s3861_s22 }
  0x4f   : > { %437 = vxpose.xlu0.c.b16.start [1/8] (narrow) %v3928_v1, 112  ;;  %v3932_v5 = vld [vmem:[%s4461_s24 + $0x90] sm:$0xff]   ;;  %v3933_v6 = vld [vmem:[%s4461_s24 + $0xd8] sm:$0xff]   ;;  %v3935_v8 = vld [vmem:[%s4461_s24 + $0xa0] sm:$0xff]   ;;  %s3862_s17 = smul.u32 7168, %s4360_s13  ;;  %s3234_s8 = sshll.u32 %s4930_s15, 4  ;;  %s5055_s8 = int_to_ptr.vmem [resolvable:$true] %s3234_s8 }
  0x50   : > { %v3934_v7 = vld [vmem:[%s4461_s24 + $0x98] sm:$0xff]   ;;  %v3936_v9 = vld [vmem:[%s4461_s24 + $0xa8] sm:$0xff]   ;;  %v3937_v10 = vld [vmem:[%s4461_s24 + $0xb0] sm:$0xff]   ;;  %s3220_s13 = scalar_lea.sflag [#allocation5], %s4455_s18  ;;  %s4245_s25 = scalar_lea.vmem %s5055_s8, 7168 }
  0x51   : > { %v3939_v11 = vld [vmem:[%s4461_s24] sm:$0xff]   ;;  %v3938_v12 = vld [vmem:[%s4461_s24 + $0xb8] sm:$0xff]   ;;  %v3941_v13 = vld [vmem:[%s4461_s24 + $0x8] sm:$0xff]   ;;  %s5053_s20 = scalar_lea.hbm %s5103_s2, %s3862_s17  ;;  %p4246_p3 = scmp.ne.s32.totalorder %s5055_s8, %s4245_s25 }
  0x52   : > { %454 = vxpose.xlu1.c.b16.cont [2/4] (short) (narrow) %v3929_v2, 112  ;;  %v3956_v14 = vld [vmem:[#allocation6 + $0x2e4] ss:$16 sps:$4 sm:$0xff]   ;;  %v3960_v17 = vld [vmem:[#allocation6 + $0x2e0] ss:$16 sps:$4 sm:$0xff]   ;;  %v3942_v19 = vld [vmem:[%s4461_s24 + $0x48] sm:$0xff]  }
  0x53   : > { %438 = vxpose.xlu0.c.b16.cont [2/8] (narrow) %v3930_v3, 112  ;;  %v3940_v15 = vld [vmem:[%s4461_s24 + $0x40] sm:$0xff]   ;;  %v3943_v16 = vld [vmem:[%s4461_s24 + $0x10] sm:$0xff]   ;;  %2307 = vmatprep.subr.bf16.mxu1 %v3956_v14  ;;  %v3945_v20 = vld [vmem:[%s4461_s24 + $0x18] sm:$0xff]   ;;  %p5170_p11 = scmp.ne.s32.totalorder %s5130_s30, 0  ;;  %s4321_s26 = smov [#allocation8]  }
  0x54   : > { %v3961_v18 = vld [vmem:[#allocation6 + $0x2c4] ss:$16 sps:$4 sm:$0xff]   ;;  %2308 = vmatpush1.bf16.msra.mxu1 %v3960_v17  ;;  %v3965_v21 = vld [vmem:[#allocation6 + $0x2c0] ss:$16 sps:$4 sm:$0xff]   ;;  %v3946_v27 = vld [vmem:[%s4461_s24 + $0x58] sm:$0xff]   ;;  %s4249_s27 = sshll.u32 %s4321_s26, 4  ;;  %s4250_s27 = int_to_ptr.vmem [resolvable:$false] %s4249_s27 }
  0x55   : > { %2309 = vmatprep.subr.bf16.mxu1 %v3961_v18  ;;  %v3966_v22 = vld [vmem:[#allocation6 + $0x2a4] ss:$16 sps:$4 sm:$0xff]   ;;  %v3970_v25 = vld [vmem:[#allocation6 + $0x2a0] ss:$16 sps:$4 sm:$0xff]   ;;  %v3949_v28 = vld [vmem:[%s4461_s24 + $0x28] sm:$0xff]   ;;  %p4247_p7 = pnand %p4246_p3, %p5170_p11  ;;  %s4251_s28 = scalar_lea.vmem %s4250_s27, 14336 }
  0x56   : > { %455 = vxpose.xlu1.c.b16.cont [3/4] (short) (narrow) %v3931_v4, 112  ;;  %v3944_v23 = vld [vmem:[%s4461_s24 + $0x50] sm:$0xff]   ;;  %v3947_v24 = vld [vmem:[%s4461_s24 + $0x20] sm:$0xff]   ;;  %v3950_v38 = vld [vmem:[%s4461_s24 + $0x68] sm:$0xff]   ;;  %p4252_p10 = scmp.lt.s32.totalorder %s5055_s8, %s4250_s27  ;;  %p4253_p2 = scmp.lt.s32.totalorder %s4251_s28, %s4245_s25 }
  0x57   : > { %439 = vxpose.xlu0.c.b16.cont [3/8] (narrow) %v3932_v5, 112  ;;  %v3971_v26 = vld [vmem:[#allocation6 + $0x284] ss:$16 sps:$4 sm:$0xff]   ;;  %v3975_v29 = vld [vmem:[#allocation6 + $0x280] ss:$16 sps:$4 sm:$0xff]   ;;  %v3953_v42 = vld [vmem:[%s4461_s24 + $0x38] sm:$0xff]   ;;  %p4248_p12 = pneg %p4247_p7 }
  0x58   : > { %2310 = vmatpush1.bf16.msra.mxu1 %v3965_v21  ;;  %v3976_v30 = vld [vmem:[#allocation6 + $0xe4] ss:$16 sps:$4 sm:$0xff]   ;;  %v3981_v34 = vld [vmem:[#allocation6 + $0xe0] ss:$16 sps:$4 sm:$0xff]   ;;  %v3954_v50 = vld [vmem:[%s4461_s24 + $0x78] sm:$0xff]   ;;  %p4254_p13 = por %p4253_p2, %p4252_p10 }
  0x59   : > { %2311 = vmatprep.subr.bf16.mxu1 %v3966_v22  ;;  %v3978_v31 = vld [vmem:[#allocation6 + $0x264] ss:$16 sps:$4 sm:$0xff]   ;;  %2134 = vmatprep.subr.bf16.mxu0 %v3976_v30  ;;  %v3982_v35 = vld [vmem:[#allocation6 + $0x260] ss:$16 sps:$4 sm:$0xff]   ;;  %v3959_v51 = vld [vmem:[%s4461_s24 + $0x168] sm:$0xff]  }
  0x5a   : > { %456 = vxpose.xlu1.c.b16.end [4/4] (short) (narrow) %v3933_v6, 112  ;;  %v3948_v32 = vld [vmem:[%s4461_s24 + $0x60] sm:$0xff]   ;;  %v3951_v33 = vld [vmem:[%s4461_s24 + $0x30] sm:$0xff]   ;;  %2135 = vmatpush1.bf16.msra.mxu0 %v3981_v34  ;;  %v3963_v62 = vld [vmem:[%s4461_s24 + $0x1a8] sm:$0xff]   ;;  %p4255_p0 = pnand %p4254_p13, %p4248_p12 }
  0x5b   : > { %440 = vxpose.xlu0.c.b16.cont [4/8] (narrow) %v3934_v7, 112  ;;  %v3983_v36 = vld [vmem:[#allocation6 + $0xc4] ss:$16 sps:$4 sm:$0xff]   ;;  %v3988_v39 = vld [vmem:[#allocation6 + $0xc0] ss:$16 sps:$4 sm:$0xff]   ;;  %v3969_v63 = vld [vmem:[%s4461_s24 + $0x178] sm:$0xff]  }
  0x5c   : > { %2312 = vmatpush1.bf16.msra.mxu1 %v3970_v25  ;;  %v3985_v37 = vld [vmem:[#allocation6 + $0x244] ss:$16 sps:$4 sm:$0xff]   ;;  %2136 = vmatprep.subr.bf16.mxu0 %v3983_v36  ;;  %v3989_v40 = vld [vmem:[#allocation6 + $0x240] ss:$16 sps:$4 sm:$0xff]   ;;  %v3994_v18 = vld [vmem:[%s4461_s24 + $0x198] sm:$0xff]  }
  0x5d   : > { %2313 = vmatprep.subr.bf16.mxu1 %v3971_v26  ;;  %v3990_v41 = vld [vmem:[#allocation6 + $0xa4] ss:$16 sps:$4 sm:$0xff]   ;;  %v3995_v45 = vld [vmem:[#allocation6 + $0xa0] ss:$16 sps:$4 sm:$0xff]   ;;  %v4009_v25 = vld [vmem:[%s4461_s24 + $0xe8] sm:$0xff]  }
  0x5e   : > { %2137 = vmatpush1.bf16.msra.mxu0 %v3988_v39  ;;  %v3992_v43 = vld [vmem:[#allocation6 + $0x224] ss:$16 sps:$4 sm:$0xff]   ;;  %v3996_v46 = vld [vmem:[#allocation6 + $0x220] ss:$16 sps:$4 sm:$0xff]   ;;  %v4010_v26 = vld [vmem:[%s4461_s24 + $0x128] sm:$0xff]  }
  0x5f   : > { %441 = vxpose.xlu0.c.b16.cont [5/8] (narrow) %v3935_v8, 112  ;;  %v3952_v44 = vld [vmem:[%s4461_s24 + $0x70] sm:$0xff]   ;;  %2138 = vmatprep.subr.bf16.mxu0 %v3990_v41  ;;  %v3955_v48 = vld [vmem:[%s4461_s24 + $0x160] sm:$0xff]   ;;  %v3973_v8 = vld [vmem:[%s4461_s24 + $0x1b8] sm:$0xff]  }
  0x60   : > { %2314 = vmatpush1.bf16.msra.mxu1 %v3975_v29  ;;  %v3997_v47 = vld [vmem:[#allocation6 + $0x84] ss:$16 sps:$4 sm:$0xff]   ;;  %v4003_v52 = vld [vmem:[#allocation6 + $0x80] ss:$16 sps:$4 sm:$0xff]   ;;  %v4025_v34 = vld [vmem:[%s4461_s24 + $0xf8] sm:$0xff]  }
  0x61   : > { %2315 = vmatprep.subr.bf16.mxu1 %v3978_v31  ;;  %v3999_v49 = vld [vmem:[#allocation6 + $0x204] ss:$16 sps:$4 sm:$0xff]   ;;  %v4004_v53 = vld [vmem:[#allocation6 + $0x200] ss:$16 sps:$4 sm:$0xff]   ;;  %vm4519_vm2 = vmor %vm611_vm1, %vm610_vm0 }
  0x62   : > { %2139 = vmatpush1.bf16.msra.mxu0 %v3995_v45  ;;  %v4005_v54 = vld [vmem:[#allocation6 + $0x64] ss:$16 sps:$4 sm:$0xff]   ;;  %v4011_v58 = vld [vmem:[#allocation6 + $0x60] ss:$16 sps:$4 sm:$0xff]  }
  0x63   : > { %442 = vxpose.xlu0.c.b16.cont [6/8] (narrow) %v3936_v9, 112  ;;  %2140 = vmatprep.subr.bf16.mxu0 %v3997_v47  ;;  %v4007_v55 = vld [vmem:[#allocation6 + $0x364] ss:$16 sps:$4 sm:$0xff]   ;;  %v4012_v59 = vld [vmem:[#allocation6 + $0x360] ss:$16 sps:$4 sm:$0xff]   ;;  %v3980_v9 = vld [vmem:[%s4461_s24 + $0x188] sm:$0xff]  }
  0x64   : > { %2316 = vmatpush1.bf16.msra.mxu1 %v3982_v35  ;;  %v3958_v56 = vld [vmem:[%s4461_s24 + $0x1a0] sm:$0xff]   ;;  %v3964_v57 = vld [vmem:[%s4461_s24 + $0x170] sm:$0xff]   ;;  %v4026_v35 = vld [vmem:[%s4461_s24 + $0x138] sm:$0xff]  }
  0x65   : > { %2317 = vmatprep.subr.bf16.mxu1 %v3985_v37  ;;  %v4013_v60 = vld [vmem:[#allocation6 + $0x44] ss:$16 sps:$4 sm:$0xff]   ;;  %v4019_v0 = vld [vmem:[#allocation6 + $0x40] ss:$16 sps:$4 sm:$0xff]  }
  0x66   : > { %2141 = vmatpush1.bf16.msra.mxu0 %v4003_v52  ;;  %v4015_v61 = vld [vmem:[#allocation6 + $0x344] ss:$16 sps:$4 sm:$0xff]   ;;  %v4020_v1 = vld [vmem:[#allocation6 + $0x340] ss:$16 sps:$4 sm:$0xff]   ;;  %v4043_v52 = vld [vmem:[%s4461_s24 + $0x148] sm:$0xff]  }
  0x67   : > { %443 = vxpose.xlu0.c.b16.cont [7/8] (narrow) %v3937_v10, 112  ;;  %405 = vxpose.xlu1.c.b16.start [1/8] (narrow) %v3939_v11, 112  ;;  %v4021_v2 = vld [vmem:[#allocation6 + $0x24] ss:$16 sps:$4 sm:$0xff]   ;;  %v4027_v6 = vld [vmem:[#allocation6 + $0x20] ss:$16 sps:$4 sm:$0xff]  }
  0x68   : > { %2318 = vmatpush1.bf16.msra.mxu1 %v3989_v40  ;;  %2142 = vmatprep.subr.bf16.mxu0 %v4005_v54  ;;  %v3968_v3 = vld [vmem:[%s4461_s24 + $0x1b0] sm:$0xff]   ;;  %v3974_v5 = vld [vmem:[%s4461_s24 + $0x180] sm:$0xff]  }
  0x69   : > { %2319 = vmatprep.subr.bf16.mxu1 %v3992_v43  ;;  %v4023_v4 = vld [vmem:[#allocation6 + $0x324] ss:$16 sps:$4 sm:$0xff]   ;;  %v4028_v7 = vld [vmem:[#allocation6 + $0x320] ss:$16 sps:$4 sm:$0xff]  }
  0x6a   : > { %2143 = vmatpush1.bf16.msra.mxu0 %v4011_v58  ;;  %v4029_v10 = vld [vmem:[#allocation6 + $0x4] ss:$16 sps:$4 sm:$0xff]   ;;  %v4036_v14 = vld [vmem:[#allocation6 + $0x300] ss:$16 sps:$4 sm:$0xff]  }
  0x6b   : > { %444 = vxpose.xlu0.c.b16.end [8/8] (narrow) %v3938_v12, 112  ;;  %406 = vxpose.xlu1.c.b16.cont [2/8] (narrow) %v3941_v13, 112  ;;  %v4031_v11 = vld [vmem:[#allocation6 + $0x304] ss:$16 sps:$4 sm:$0xff]   ;;  %v4035_v13 = vld [vmem:[#allocation6] ss:$16 sps:$4 sm:$0xff]  }
  0x6c   : > { %2320 = vmatpush1.bf16.msra.mxu1 %v3996_v46  ;;  %2144 = vmatprep.subr.bf16.mxu0 %v4013_v60  ;;  %v3987_v12 = vld [vmem:[%s4461_s24 + $0x190] sm:$0xff]   ;;  %v4001_v21 = vld [vmem:[%s4461_s24 + $0xe0] sm:$0xff]  }
  0x6d   : > { %2321 = vmatprep.subr.bf16.mxu1 %v3999_v49  ;;  %v4045_v17 = vld [vmem:[#allocation6 + $0x1c4] ss:$16 sps:$4 sm:$0xff]   ;;  %v4074_v37 = vld [vmem:[#allocation6 + $0x140] ss:$16 sps:$4 sm:$0xff]  }
  0x6e   : > { %2145 = vmatpush1.bf16.msra.mxu0 %v4019_v0  ;;  %v4002_v22 = vld [vmem:[%s4461_s24 + $0x120] sm:$0xff]   ;;  %v4017_v30 = vld [vmem:[%s4461_s24 + $0xf0] sm:$0xff]  }
  0x6f   : > { %421 = vxpose.xlu0.c.b16.start [1/8] (narrow) %v3940_v15, 112  ;;  %407 = vxpose.xlu1.c.b16.cont [3/8] (narrow) %v3943_v16, 112  ;;  %v4040_v15 = vld [vmem:[#allocation6 + $0x1e4] ss:$16 sps:$4 sm:$0xff]   ;;  %v4044_v16 = vld [vmem:[#allocation6 + $0x1e0] ss:$16 sps:$4 sm:$0xff]  }
  0x70   : > { %2322 = vmatpush1.bf16.msra.mxu1 %v4004_v53  ;;  %2146 = vmatprep.subr.bf16.mxu0 %v4021_v2  ;;  %v4063_v29 = vld [vmem:[#allocation6 + $0x164] ss:$16 sps:$4 sm:$0xff]   ;;  %v4078_v46 = vld [vmem:[#allocation6 + $0x120] ss:$16 sps:$4 sm:$0xff]   ;;  %v4083_v2 = vld [vmem:[#allocation6 + $0xcc] ss:$16 sps:$4 sm:$0xff]  }
  0x71   : > { %2331 = vmatprep.subr.bf16.mxu1 %v4007_v55  ;;  %v4018_v31 = vld [vmem:[%s4461_s24 + $0x130] sm:$0xff]   ;;  %v4033_v43 = vld [vmem:[%s4461_s24 + $0x100] sm:$0xff]  }
  0x72   : > { %2147 = vmatpush1.bf16.msra.mxu0 %v4027_v6  ;;  %v4075_v40 = vld [vmem:[#allocation6 + $0x124] ss:$16 sps:$4 sm:$0xff]   ;;  %v4086_v54 = vld [vmem:[#allocation6 + $0x100] ss:$16 sps:$4 sm:$0xff]   ;;  %v4056_v6 = vld [vmem:[%s4461_s24 + $0x158] sm:$0xff]  }
  0x73   : > { %422 = vxpose.xlu0.c.b16.cont [2/8] (narrow) %v3942_v19, 112  ;;  %408 = vxpose.xlu1.c.b16.cont [4/8] (narrow) %v3945_v20, 112  ;;  %v4049_v19 = vld [vmem:[#allocation6 + $0x1c0] ss:$16 sps:$4 sm:$0xff]   ;;  %v4052_v20 = vld [vmem:[#allocation6 + $0x1a4] ss:$16 sps:$4 sm:$0xff]  }
  0x74   : > { %2332 = vmatpush2.bf16.msra.mxu1 %v4012_v59  ;;  %2148 = vmatprep.subr.bf16.mxu0 %v4029_v10  ;;  %v4047_v59 = vld [vmem:[%s4461_s24 + $0x110] sm:$0xff]  }
  0x75   : > { %2333 = vmatprep.subr.bf16.mxu1 %v4015_v61  ;;  %v4048_v60 = vld [vmem:[%s4461_s24 + $0x150] sm:$0xff]   ;;  %v4069_v61 = vld [vmem:[#allocation6 + $0xe8] ss:$16 sps:$4 sm:$0xff]  }
  0x76   : > { %2149 = vmatpush1.bf16.msra.mxu0 %v4035_v13 }
  0x77   : > { %423 = vxpose.xlu0.c.b16.cont [3/8] (narrow) %v3944_v23, 112  ;;  %409 = vxpose.xlu1.c.b16.cont [5/8] (narrow) %v3947_v24, 112  ;;  %v4057_v23 = vld [vmem:[#allocation6 + $0x1a0] ss:$16 sps:$4 sm:$0xff]   ;;  %v4058_v24 = vld [vmem:[#allocation6 + $0x184] ss:$16 sps:$4 sm:$0xff]  }
  0x78   : > { %2334 = vmatpush2.bf16.msra.mxu1 %v4020_v1  ;;  %2150 = vmatprep.subr.bf16.mxu0 %v4040_v15 }
  0x79   : > { %2335 = vmatprep.subr.bf16.mxu1 %v4023_v4 }
  0x7a   : > { %2151 = vmatpush2.bf16.msra.mxu0 %v4044_v16 }
  0x7b   : > { %424 = vxpose.xlu0.c.b16.cont [4/8] (narrow) %v3946_v27, 112  ;;  %410 = vxpose.xlu1.c.b16.cont [6/8] (narrow) %v3949_v28, 112  ;;  %v4060_v27 = vld [vmem:[#allocation6 + $0x180] ss:$16 sps:$4 sm:$0xff]   ;;  %v4071_v28 = vld [vmem:[#allocation6 + $0xec] ss:$16 sps:$4 sm:$0xff]  }
  0x7c   : > { %2336 = vmatpush2.bf16.msra.mxu1 %v4028_v7  ;;  %2152 = vmatprep.subr.bf16.mxu0 %v4045_v17 }
  0x7d   : > { %2337 = vmatprep.subr.bf16.mxu1 %v4031_v11  ;;  %v4092_v11 = vld [vmem:[#allocation6 + $0xac] ss:$16 sps:$4 sm:$0xff]  }
  0x7e   : > { %2153 = vmatpush2.bf16.msra.mxu0 %v4049_v19  ;;  %v4099_v19 = vld [vmem:[#allocation6 + $0x8c] ss:$16 sps:$4 sm:$0xff]  }
  0x7f   : > { %425 = vxpose.xlu0.c.b16.cont [5/8] (narrow) %v3948_v32, 112  ;;  %411 = vxpose.xlu1.c.b16.cont [7/8] (narrow) %v3951_v33, 112  ;;  %v4066_v32 = vld [vmem:[#allocation6 + $0x160] ss:$16 sps:$4 sm:$0xff]   ;;  %v4072_v33 = vld [vmem:[#allocation6 + $0x144] ss:$16 sps:$4 sm:$0xff]  }
  0x80   : > { %2338 = vmatpush2.bf16.msra.mxu1 %v4036_v14  ;;  %2154 = vmatprep.subr.bf16.mxu0 %v4052_v20  ;;  %v4090_v14 = vld [vmem:[#allocation6 + $0xa8] ss:$16 sps:$4 sm:$0xff]  }
  0x81   : > { %2480 = vmatprep.subr.bf16.mxu1 %v4071_v28  ;;  %v4105_v28 = vld [vmem:[#allocation6 + $0x68] ss:$16 sps:$4 sm:$0xff]  }
  0x82   : > { %2155 = vmatpush2.bf16.msra.mxu0 %v4057_v23  ;;  %v4097_v23 = vld [vmem:[#allocation6 + $0x88] ss:$16 sps:$4 sm:$0xff]  }
  0x83   : > { %426 = vxpose.xlu0.c.b16.cont [6/8] (narrow) %v3950_v38, 112  ;;  %412 = vxpose.xlu1.c.b16.end [8/8] (narrow) %v3953_v42, 112  ;;  %v5136_v38 = vmov 0 }
  0x84   : > { %2156 = vmatprep.subr.bf16.mxu0 %v4058_v24  ;;  %v5137_v38 = vsel %vm4519_vm2, 4294967295, %v5136_v38 }
  0x85   : > { %5138 = vst [vmem:[#allocation12_spill] sm:$0xff] %v5137_v38 }
  0x86   : > { %2157 = vmatpush2.bf16.msra.mxu0 %v4060_v27 }
  0x87   : > { %427 = vxpose.xlu0.c.b16.cont [7/8] (narrow) %v3952_v44, 112  ;;  %897 = vxpose.xlu1.c.b16.start [1/8] (narrow) %v3955_v48, 112  ;;  %v4034_v44 = vld [vmem:[%s4461_s24 + $0x140] sm:$0xff]  }
  0x88   : > { %2158 = vmatprep.subr.bf16.mxu0 %v4063_v29  ;;  %v4084_v48 = vld [vmem:[#allocation6 + $0x104] ss:$16 sps:$4 sm:$0xff]  }
  0x8a   : > { %2159 = vmatpush2.bf16.msra.mxu0 %v4066_v32  ;;  %v4111_v32 = vld [vmem:[#allocation6 + $0x4c] ss:$16 sps:$4 sm:$0xff]  }
  0x8b   : > { %428 = vxpose.xlu0.c.b16.end [8/8] (narrow) %v3954_v50, 112  ;;  %898 = vxpose.xlu1.c.b16.cont [2/8] (narrow) %v3959_v51, 112  ;;  %v4042_v51 = vld [vmem:[%s4461_s24 + $0x108] sm:$0xff]  }
  0x8c   : > { %2160 = vmatprep.subr.bf16.mxu0 %v4072_v33 }
  0x8e   : > { %2161 = vmatpush2.bf16.msra.mxu0 %v4074_v37  ;;  %v4593_v37 = vld [vmem:[#allocation6 + $0x2e8] ss:$16 sps:$4 sm:$0xff]  }
  0x8f   : > { %913 = vxpose.xlu0.c.b16.start [1/4] (short) (narrow) %v3958_v56, 112  ;;  %899 = vxpose.xlu1.c.b16.cont [3/8] (narrow) %v3964_v57, 112  ;;  %v4535_v56 = vld [vmem:[#allocation6 + $0x2ec] ss:$16 sps:$4 sm:$0xff]  }
  0x90   : > { %2162 = vmatprep.subr.bf16.mxu0 %v4075_v40  ;;  %v4597_v40 = vld [vmem:[#allocation6 + $0x2cc] ss:$16 sps:$4 sm:$0xff]  }
  0x92   : > { %2163 = vmatpush2.bf16.msra.mxu0 %v4078_v46 }
  0x93   : > { %914 = vxpose.xlu0.c.b16.cont [2/4] (short) (narrow) %v3963_v62, 112  ;;  %900 = vxpose.xlu1.c.b16.cont [4/8] (narrow) %v3969_v63, 112 }
  0x94   : > { %2164 = vmatprep.subr.bf16.mxu0 %v4084_v48 }
  0x96   : > { %2165 = vmatpush2.bf16.msra.mxu0 %v4086_v54 }
  0x97   : > { %915 = vxpose.xlu0.c.b16.cont [3/4] (short) (narrow) %v3968_v3, 112  ;;  %901 = vxpose.xlu1.c.b16.cont [5/8] (narrow) %v3974_v5, 112  ;;  %v4055_v5 = vld [vmem:[%s4461_s24 + $0x118] sm:$0xff]  }
  0x98   : > { %2653 = vmatprep.subr.bf16.mxu0 %v4535_v56 }
  0x9b   : > { %916 = vxpose.xlu0.c.b16.end [4/4] (short) (narrow) %v3973_v8, 112  ;;  %902 = vxpose.xlu1.c.b16.cont [6/8] (narrow) %v3980_v9, 112  ;;  %v4081_v9 = vld [vmem:[#allocation6 + $0xc8] ss:$16 sps:$4 sm:$0xff]  }
  0x9f   : > { %903 = vxpose.xlu1.c.b16.cont [7/8] (narrow) %v3987_v12, 112 }
  0xa3   : > { %904 = vxpose.xlu1.c.b16.end [8/8] (narrow) %v3994_v18, 112 }
  0xa7   : > { %881 = vxpose.xlu1.c.b16.start [1/8] (narrow) %v4002_v22, 112 }
  0xa8   : > { %865 = vxpose.xlu0.c.b16.start [1/8] (narrow) %v4001_v21, 112 }
  0xab   : > { %882 = vxpose.xlu1.c.b16.cont [2/8] (narrow) %v4010_v26, 112 }
  0xac   : > { %866 = vxpose.xlu0.c.b16.cont [2/8] (narrow) %v4009_v25, 112  ;;  %v4107_v25 = vld [vmem:[#allocation6 + $0x6c] ss:$16 sps:$4 sm:$0xff]  }
  0xaf   : > { %883 = vxpose.xlu1.c.b16.cont [3/8] (narrow) %v4018_v31, 112 }
  0xb0   : > { %v461_v36 = vpop.trf.xlu1  ;;  %867 = vxpose.xlu0.c.b16.cont [3/8] (narrow) %v4017_v30, 112 }
  0xb1   : > { %v445_v39 = vpop.trf.xlu0 }
  0xb2   : > { %v3355_v41 = vcombine.low %v445_v39, %v461_v36  ;;  %v3357_v42 = vcombine.high %v445_v39, %v461_v36  ;;  %v4117_v36 = vld [vmem:[#allocation6 + $0x2c] ss:$16 sps:$4 sm:$0xff]  }
  0xb3   : > { %884 = vxpose.xlu1.c.b16.cont [4/8] (narrow) %v4026_v35, 112 }
  0xb4   : > { %613 = vst.msk [vmem:[#allocation2 + $0x8] sm:$0xff] %vm4519_vm2, %v3355_v41  ;;  %615 = vst.msk [vmem:[#allocation2 + $0x18] sm:$0xff] %vm4519_vm2, %v3357_v42  ;;  %868 = vxpose.xlu0.c.b16.cont [4/8] (narrow) %v4025_v34, 112  ;;  %v462_v45 = vpop.trf.xlu1  ;;  %v4109_v34 = vld [vmem:[#allocation6 + $0x48] ss:$16 sps:$4 sm:$0xff]  }
  0xb5   : > { %v446_v47 = vpop.trf.xlu0 }
  0xb6   : > { %v3359_v49 = vcombine.low %v446_v47, %v462_v45  ;;  %v3361_v50 = vcombine.high %v446_v47, %v462_v45  ;;  %v4128_v45 = vld [vmem:[#allocation6 + $0xc] ss:$16 sps:$4 sm:$0xff]   ;;  %v4613_v47 = vld [vmem:[#allocation6 + $0x2c8] ss:$16 sps:$4 sm:$0xff]  }
  0xb7   : > { %885 = vxpose.xlu1.c.b16.cont [5/8] (narrow) %v4034_v44, 112 }
  0xb8   : > { %617 = vst.msk [vmem:[#allocation2 + $0x28] sm:$0xff] %vm4519_vm2, %v3359_v49  ;;  %619 = vst.msk [vmem:[#allocation2 + $0x38] sm:$0xff] %vm4519_vm2, %v3361_v50  ;;  %869 = vxpose.xlu0.c.b16.cont [5/8] (narrow) %v4033_v43, 112  ;;  %v463_v53 = vpop.trf.xlu1  ;;  %v4115_v43 = vld [vmem:[#allocation6 + $0x28] ss:$16 sps:$4 sm:$0xff]  }
  0xb9   : > { %v447_v55 = vpop.trf.xlu0  ;;  %v4618_v49 = vld [vmem:[#allocation6 + $0x2ac] ss:$16 sps:$4 sm:$0xff]   ;;  %v4126_v50 = vld [vmem:[#allocation6 + $0x8] ss:$16 sps:$4 sm:$0xff]  }
  0xba   : > { %v3363_v57 = vcombine.low %v447_v55, %v463_v53  ;;  %v3365_v58 = vcombine.high %v447_v55, %v463_v53  ;;  %v4628_v55 = vld [vmem:[#allocation6 + $0x2a8] ss:$16 sps:$4 sm:$0xff]  }
  0xbb   : > { %v4539_v62 = vld [vmem:[#allocation2 + $0x8] ss:$16 sps:$4 sm:$0xff]   ;;  %886 = vxpose.xlu1.c.b16.cont [6/8] (narrow) %v4043_v52, 112  ;;  %v4545_v63 = vld [vmem:[#allocation2 + $0xc] ss:$16 sps:$4 sm:$0xff]  }
  0xbc   : > { %621 = vst.msk [vmem:[#allocation2 + $0x48] sm:$0xff] %vm4519_vm2, %v3363_v57  ;;  %623 = vst.msk [vmem:[#allocation2 + $0x58] sm:$0xff] %vm4519_vm2, %v3365_v58  ;;  %870 = vxpose.xlu0.c.b16.cont [6/8] (narrow) %v4042_v51, 112  ;;  %v464_v0 = vpop.trf.xlu1  ;;  %3662 = vmatprep.mubr.msk.bf16.mxu1 %vm2091_vm3, %v4545_v63  ;;  %v4136_v51 = vld [vmem:[#allocation6 + $0x1ec] ss:$16 sps:$4 sm:$0xff]  }
  0xbd   : > { %v448_v1 = vpop.trf.xlu0  ;;  %2340 = vmatmul.mubr.bf16.vlgmr.msra.gmra.mxu1 %v4539_v62  ;;  %v4134_v57 = vld [vmem:[#allocation6 + $0x1e8] ss:$16 sps:$4 sm:$0xff]  }
  0xbe   : > { %v3367_v3 = vcombine.low %v448_v1, %v464_v0  ;;  %v3369_v4 = vcombine.high %v448_v1, %v464_v0  ;;  %2481 = vmatpush1.bf16.msra.mxu1 %v4069_v61  ;;  %v4645_v1 = vld [vmem:[#allocation6 + $0x288] ss:$16 sps:$4 sm:$0xff]  }
  0xbf   : > { %887 = vxpose.xlu1.c.b16.cont [7/8] (narrow) %v4048_v60, 112  ;;  %v4553_v7 = vld [vmem:[#allocation2 + $0x2c] ss:$16 sps:$4 sm:$0xff]   ;;  %2482 = vmatprep.subr.bf16.mxu1 %v4083_v2  ;;  %v4561_v15 = vld [vmem:[#allocation2 + $0x28] ss:$16 sps:$4 sm:$0xff]  }
  0xc0   : > { %625 = vst.msk [vmem:[#allocation2 + $0x68] sm:$0xff] %vm4519_vm2, %v3367_v3  ;;  %627 = vst.msk [vmem:[#allocation2 + $0x78] sm:$0xff] %vm4519_vm2, %v3369_v4  ;;  %871 = vxpose.xlu0.c.b16.cont [7/8] (narrow) %v4047_v59, 112  ;;  %v465_v8 = vpop.trf.xlu1  ;;  %3663 = vmatprep.mubr.msk.bf16.mxu1 %vm2091_vm3, %v4553_v7  ;;  %v4633_v59 = vld [vmem:[#allocation6 + $0x28c] ss:$16 sps:$4 sm:$0xff]  }
  0xc1   : > { %v449_v10 = vpop.trf.xlu0  ;;  %v4141_v60 = vld [vmem:[#allocation6 + $0x1cc] ss:$16 sps:$4 sm:$0xff]   ;;  %v4139_v2 = vld [vmem:[#allocation6 + $0x1c8] ss:$16 sps:$4 sm:$0xff]  }
  0xc2   : > { %v3371_v12 = vcombine.low %v449_v10, %v465_v8  ;;  %v3373_v13 = vcombine.high %v449_v10, %v465_v8  ;;  %2483 = vmatpush1.bf16.msra.mxu1 %v4081_v9  ;;  %v4648_v3 = vld [vmem:[#allocation6 + $0x26c] ss:$16 sps:$4 sm:$0xff]   ;;  %v4657_v9 = vld [vmem:[#allocation6 + $0x268] ss:$16 sps:$4 sm:$0xff]  }
  0xc3   : > { %888 = vxpose.xlu1.c.b16.end [8/8] (narrow) %v4056_v6, 112  ;;  %v4567_v17 = vld [vmem:[#allocation2 + $0x4c] ss:$16 sps:$4 sm:$0xff]   ;;  %2484 = vmatprep.subr.bf16.mxu1 %v4092_v11  ;;  %v4576_v29 = vld [vmem:[#allocation2 + $0x48] ss:$16 sps:$4 sm:$0xff]  }
  0xc4   : > { %629 = vst.msk [vmem:[#allocation2 + $0x88] sm:$0xff] %vm4519_vm2, %v3371_v12  ;;  %631 = vst.msk [vmem:[#allocation2 + $0x98] sm:$0xff] %vm4519_vm2, %v3373_v13  ;;  %872 = vxpose.xlu0.c.b16.end [8/8] (narrow) %v4055_v5, 112  ;;  %v466_v16 = vpop.trf.xlu1  ;;  %v4150_v4 = vld [vmem:[#allocation6 + $0x1ac] ss:$16 sps:$4 sm:$0xff]  }
  0xc5   : > { %v450_v18 = vpop.trf.xlu0  ;;  %2350 = vmatmul.mubr.bf16.gmra.mxu1 %v4561_v15  ;;  %v4148_v10 = vld [vmem:[#allocation6 + $0x1a8] ss:$16 sps:$4 sm:$0xff]   ;;  %v4662_v12 = vld [vmem:[#allocation6 + $0x24c] ss:$16 sps:$4 sm:$0xff]  }
  0xc6   : > { %v3375_v20 = vcombine.low %v450_v18, %v466_v16  ;;  %v3377_v21 = vcombine.high %v450_v18, %v466_v16  ;;  %3664 = vmatprep.mubr.msk.bf16.mxu1 %vm2091_vm3, %v4567_v17  ;;  %2485 = vmatpush1.bf16.msra.mxu1 %v4090_v14  ;;  %v4157_v13 = vld [vmem:[#allocation6 + $0x18c] ss:$16 sps:$4 sm:$0xff]   ;;  %v4672_v18 = vld [vmem:[#allocation6 + $0x248] ss:$16 sps:$4 sm:$0xff]  }
  0xc7   : > { %2486 = vmatprep.subr.bf16.mxu1 %v4099_v19  ;;  %v4584_v31 = vld [vmem:[#allocation2 + $0x6c] ss:$16 sps:$4 sm:$0xff]   ;;  %v4599_v41 = vld [vmem:[#allocation2 + $0x68] ss:$16 sps:$4 sm:$0xff]  }
  0xc8   : > { %633 = vst.msk [vmem:[#allocation2 + $0xa8] sm:$0xff] %vm4519_vm2, %v3375_v20  ;;  %635 = vst.msk [vmem:[#allocation2 + $0xb8] sm:$0xff] %vm4519_vm2, %v3377_v21  ;;  %v467_v22 = vpop.trf.xlu1  ;;  %v4155_v19 = vld [vmem:[#allocation6 + $0x188] ss:$16 sps:$4 sm:$0xff]   ;;  %v4675_v20 = vld [vmem:[#allocation6 + $0x22c] ss:$16 sps:$4 sm:$0xff]  }
  0xc9   : > { %v451_v24 = vpop.trf.xlu0  ;;  %v4165_v21 = vld [vmem:[#allocation6 + $0x16c] ss:$16 sps:$4 sm:$0xff]  }
  0xca   : > { %v3379_v26 = vcombine.low %v451_v24, %v467_v22  ;;  %v3381_v27 = vcombine.high %v451_v24, %v467_v22  ;;  %2487 = vmatpush1.bf16.msra.mxu1 %v4097_v23  ;;  %v4680_v24 = vld [vmem:[#allocation6 + $0x228] ss:$16 sps:$4 sm:$0xff]  }
  0xcb   : > { %2488 = vmatprep.subr.bf16.mxu1 %v4107_v25  ;;  %v4603_v44 = vld [vmem:[#allocation2 + $0x8c] ss:$16 sps:$4 sm:$0xff]   ;;  %v4624_v53 = vld [vmem:[#allocation2 + $0x88] ss:$16 sps:$4 sm:$0xff]  }
  0xcc   : > { %637 = vst.msk [vmem:[#allocation2 + $0xc8] sm:$0xff] %vm4519_vm2, %v3379_v26  ;;  %639 = vst.msk [vmem:[#allocation2 + $0xd8] sm:$0xff] %vm4519_vm2, %v3381_v27  ;;  %v4582_v30 = vpop.trf.xlu1  ;;  %v4163_v25 = vld [vmem:[#allocation6 + $0x168] ss:$16 sps:$4 sm:$0xff]   ;;  %v4683_v26 = vld [vmem:[#allocation6 + $0x20c] ss:$16 sps:$4 sm:$0xff]  }
  0xcd   : > { %2360 = vmatmul.mubr.bf16.gmra.mxu1 %v4576_v29  ;;  %v4171_v27 = vld [vmem:[#allocation6 + $0x14c] ss:$16 sps:$4 sm:$0xff]  }
  0xce   : > { %3665 = vmatprep.mubr.msk.bf16.mxu1 %vm2091_vm3, %v4584_v31  ;;  %2489 = vmatpush1.bf16.msra.mxu1 %v4105_v28 }
  0xcf   : > { %2490 = vmatprep.subr.bf16.mxu1 %v4111_v32  ;;  %v4631_v58 = vld [vmem:[#allocation2 + $0xac] ss:$16 sps:$4 sm:$0xff]   ;;  %v4652_v6 = vld [vmem:[#allocation2 + $0xa8] ss:$16 sps:$4 sm:$0xff]  }
  0xd0   : > { %v4589_v33 = vpop.trf.xlu1  ;;  %5139 = vst [vmem:[#allocation13_spill] sm:$0xff] %v4652_v6 }
  0xd1   : > { %v4591_v35 = vpop.trf.xlu0 }
  0xd2   : > { %2491 = vmatpush1.bf16.msra.mxu1 %v4109_v34  ;;  %2166 = vmatprep.mubr.bf16.mxu0 %v4591_v35  ;;  %v4689_v34 = vld [vmem:[#allocation6 + $0x208] ss:$16 sps:$4 sm:$0xff]  }
  0xd3   : > { %2492 = vmatprep.subr.bf16.mxu1 %v4117_v36  ;;  %2167 = vmatmul.mubr.bf16.vlgmr.msra.gmra.mxu0 %v4582_v30  ;;  %v4659_v11 = vld [vmem:[#allocation2 + $0xcc] ss:$16 sps:$4 sm:$0xff]   ;;  %v4677_v22 = vld [vmem:[#allocation2 + $0xc8] ss:$16 sps:$4 sm:$0xff]  }
  0xd4   : > { %v4595_v39 = vpop.trf.xlu1  ;;  %2654 = vmatpush1.bf16.msra.mxu0 %v4593_v37  ;;  %5140 = vst [vmem:[#allocation14_spill] sm:$0xff] %v4659_v11  ;;  %5141 = vst [vmem:[#allocation15_spill] sm:$0xff] %v4677_v22  ;;  %v4169_v36 = vld [vmem:[#allocation6 + $0x148] ss:$16 sps:$4 sm:$0xff]  }
  0xd5   : > { %v4601_v42 = vpop.trf.xlu0  ;;  %2370 = vmatmul.mubr.bf16.gmra.mxu1 %v4599_v41  ;;  %2655 = vmatprep.subr.bf16.mxu0 %v4597_v40 }
  0xd6   : > { %3666 = vmatprep.mubr.msk.bf16.mxu1 %vm2091_vm3, %v4603_v44  ;;  %2493 = vmatpush1.bf16.msra.mxu1 %v4115_v43 }
  0xd7   : > { %2176 = vmatprep.mubr.bf16.mxu0 %v4601_v42  ;;  %2494 = vmatprep.subr.bf16.mxu1 %v4128_v45 }
  0xd8   : > { %v4610_v46 = vpop.trf.xlu1  ;;  %2656 = vmatpush1.bf16.msra.mxu0 %v4613_v47 }
  0xd9   : > { %v4615_v48 = vpop.trf.xlu0  ;;  %2657 = vmatprep.subr.bf16.mxu0 %v4618_v49 }
  0xda   : > { %2495 = vmatpush1.bf16.msra.mxu1 %v4126_v50  ;;  %v4692_v50 = vld [vmem:[#allocation6 + $0x36c] ss:$16 sps:$4 sm:$0xff]  }
  0xdb   : > { %2496 = vmatprep.subr.bf16.mxu1 %v4136_v51  ;;  %2177 = vmatmul.mubr.bf16.gmra.mxu0 %v4589_v33  ;;  %v4178_v51 = vld [vmem:[#allocation6 + $0x12c] ss:$16 sps:$4 sm:$0xff]  }
  0xdc   : > { %v4621_v52 = vpop.trf.xlu1  ;;  %2186 = vmatprep.mubr.bf16.mxu0 %v4615_v48  ;;  %2658 = vmatpush1.bf16.msra.mxu0 %v4628_v55 }
  0xdd   : > { %v4626_v54 = vpop.trf.xlu0  ;;  %2380 = vmatmul.mubr.bf16.gmra.mxu1 %v4624_v53  ;;  %2659 = vmatprep.subr.bf16.mxu0 %v4633_v59 }
  0xde   : > { %3667 = vmatprep.mubr.msk.bf16.mxu1 %vm2091_vm3, %v4631_v58  ;;  %2497 = vmatpush2.bf16.msra.mxu1 %v4134_v57 }
  0xdf   : > { %2498 = vmatprep.subr.bf16.mxu1 %v4141_v60 }
  0xe0   : > { %v4639_v61 = vpop.trf.xlu1  ;;  %2660 = vmatpush1.bf16.msra.mxu0 %v4645_v1 }
  0xe1   : > { %v4642_v0 = vpop.trf.xlu0  ;;  %2661 = vmatprep.subr.bf16.mxu0 %v4648_v3 }
  0xe2   : > { %2499 = vmatpush2.bf16.msra.mxu1 %v4139_v2  ;;  %v4699_v2 = vld [vmem:[#allocation6 + $0x368] ss:$16 sps:$4 sm:$0xff]  }
  0xe3   : > { %2500 = vmatprep.subr.bf16.mxu1 %v4150_v4  ;;  %2187 = vmatmul.mubr.bf16.gmra.mxu0 %v4595_v39  ;;  %v4176_v4 = vld [vmem:[#allocation6 + $0x128] ss:$16 sps:$4 sm:$0xff]  }
  0xe4   : > { %v4650_v5 = vpop.trf.xlu1  ;;  %2196 = vmatprep.mubr.bf16.mxu0 %v4626_v54  ;;  %2662 = vmatpush1.bf16.msra.mxu0 %v4657_v9 }
  0xe5   : > { %v4654_v8 = vpop.trf.xlu0  ;;  %2390 = vmatmul.mubr.bf16.gmra.mxu1 %v4652_v6  ;;  %2663 = vmatprep.subr.bf16.mxu0 %v4662_v12 }
  0xe6   : > { %3668 = vmatprep.mubr.msk.bf16.mxu1 %vm2091_vm3, %v4659_v11  ;;  %2501 = vmatpush2.bf16.msra.mxu1 %v4148_v10 }
  0xe7   : > { %2502 = vmatprep.subr.bf16.mxu1 %v4157_v13 }
  0xe8   : > { %2664 = vmatpush1.bf16.msra.mxu0 %v4672_v18 }
  0xe9   : > { %v4669_v14 = vpop.trf.xlu0  ;;  %v905_v16 = vpop.trf.xlu1  ;;  %2665 = vmatprep.subr.bf16.mxu0 %v4675_v20 }
  0xea   : > { %2503 = vmatpush2.bf16.msra.mxu1 %v4155_v19  ;;  %v4702_v19 = vld [vmem:[#allocation6 + $0x34c] ss:$16 sps:$4 sm:$0xff]  }
  0xeb   : > { %2504 = vmatprep.subr.bf16.mxu1 %v4165_v21  ;;  %2197 = vmatmul.mubr.bf16.gmra.mxu0 %v4610_v46 }
  0xec   : > { %2206 = vmatprep.mubr.bf16.mxu0 %v4642_v0  ;;  %2666 = vmatpush1.bf16.msra.mxu0 %v4680_v24 }
  0xed   : > { %v906_v23 = vpop.trf.xlu1  ;;  %2400 = vmatmul.mubr.bf16.gmra.mxu1 %v4677_v22  ;;  %2667 = vmatprep.subr.bf16.mxu0 %v4683_v26 }
  0xee   : > { %2505 = vmatpush2.bf16.msra.mxu1 %v4163_v25 }
  0xef   : > { %2506 = vmatprep.subr.bf16.mxu1 %v4171_v27 }
  0xf0   : > { %2668 = vmatpush1.bf16.msra.mxu0 %v4689_v34 }
  0xf1   : > { %v921_v28 = vpop.trf.xlu0  ;;  %v907_v32 = vpop.trf.xlu1  ;;  %2677 = vmatprep.subr.bf16.mxu0 %v4692_v50 }
  0xf2   : > { %v3467_v43 = vcombine.low %v905_v16, %v921_v28  ;;  %v3469_v45 = vcombine.high %v905_v16, %v921_v28  ;;  %2507 = vmatpush2.bf16.msra.mxu1 %v4169_v36  ;;  %v4181_v16 = vld [vmem:[#allocation6 + $0x10c] ss:$16 sps:$4 sm:$0xff]   ;;  %v4711_v36 = vld [vmem:[#allocation6 + $0x348] ss:$16 sps:$4 sm:$0xff]  }
  0xf3   : > { %2508 = vmatprep.subr.bf16.mxu1 %v4178_v51  ;;  %2207 = vmatmul.mubr.bf16.gmra.mxu0 %v4621_v52 }
  0xf4   : > { %1070 = vst.msk [vmem:[#allocation2 + $0xe8] sm:$0xff] %vm4519_vm2, %v3467_v43  ;;  %1072 = vst.msk [vmem:[#allocation2 + $0xf8] sm:$0xff] %vm4519_vm2, %v3469_v45  ;;  %2216 = vmatprep.mubr.bf16.mxu0 %v4654_v8  ;;  %2678 = vmatpush2.bf16.msra.mxu0 %v4699_v2  ;;  %v4714_v43 = vld [vmem:[#allocation6 + $0x32c] ss:$16 sps:$4 sm:$0xff]  }
  0xf5   : > { %v922_v57 = vpop.trf.xlu0  ;;  %v908_v60 = vpop.trf.xlu1  ;;  %2679 = vmatprep.subr.bf16.mxu0 %v4702_v19 }
  0xf6   : > { %v3471_v10 = vcombine.low %v906_v23, %v922_v57  ;;  %v3473_v13 = vcombine.high %v906_v23, %v922_v57  ;;  %2509 = vmatpush2.bf16.msra.mxu1 %v4176_v4  ;;  %v4179_v23 = vld [vmem:[#allocation6 + $0x108] ss:$16 sps:$4 sm:$0xff]  }
  0xf7   : > { %2510 = vmatprep.subr.bf16.mxu1 %v4181_v16 }
  0xf8   : > { %1074 = vst.msk [vmem:[#allocation2 + $0x108] sm:$0xff] %vm4519_vm2, %v3471_v10  ;;  %1076 = vst.msk [vmem:[#allocation2 + $0x118] sm:$0xff] %vm4519_vm2, %v3473_v13  ;;  %2680 = vmatpush2.bf16.msra.mxu0 %v4711_v36  ;;  %v4728_v10 = vld [vmem:[#allocation6 + $0x328] ss:$16 sps:$4 sm:$0xff]  }
  0xf9   : > { %v923_v21 = vpop.trf.xlu0  ;;  %v909_v25 = vpop.trf.xlu1  ;;  %2681 = vmatprep.subr.bf16.mxu0 %v4714_v43 }
  0xfa   : > { %v3475_v27 = vcombine.low %v907_v32, %v923_v21  ;;  %v3477_v28 = vcombine.high %v907_v32, %v923_v21  ;;  %2511 = vmatpush2.bf16.msra.mxu1 %v4179_v23  ;;  %v4734_v21 = vld [vmem:[#allocation6 + $0x30c] ss:$16 sps:$4 sm:$0xff]  }
  0xfb   : > { %v4716_v45 = vld [vmem:[#allocation2 + $0xec] ss:$16 sps:$4 sm:$0xff]   ;;  %v4722_v51 = vld [vmem:[#allocation2 + $0xe8] ss:$16 sps:$4 sm:$0xff]   ;;  %2217 = vmatmul.mubr.bf16.gmra.mxu0 %v4639_v61  ;;  %3835 = vmatprep.subr.bf16.mxu1 %v4535_v56 }
  0xfc   : > { %5142 = vst [vmem:[#allocation16_spill] sm:$0xff] %v4716_v45  ;;  %1078 = vst.msk [vmem:[#allocation2 + $0x128] sm:$0xff] %vm4519_vm2, %v3475_v27  ;;  %3669 = vmatprep.mubr.msk.bf16.mxu1 %vm2091_vm3, %v4716_v45  ;;  %2226 = vmatprep.mubr.bf16.mxu0 %v4669_v14 }
  0xfd   : > { %1080 = vst.msk [vmem:[#allocation2 + $0x138] sm:$0xff] %vm4519_vm2, %v3477_v28  ;;  %5143 = vst [vmem:[#allocation17_spill] sm:$0xff] %v4722_v51  ;;  %v924_v57 = vpop.trf.xlu0  ;;  %2410 = vmatmul.mubr.bf16.gmra.mxu1 %v4722_v51  ;;  %v910_v16 = vpop.trf.xlu1  ;;  %2682 = vmatpush2.bf16.msra.mxu0 %v4728_v10  ;;  %v4745_v51 = vld [vmem:[#allocation6 + $0x308] ss:$16 sps:$4 sm:$0xff]  }
  0xfe   : > { %v3479_v32 = vcombine.low %v908_v60, %v924_v57  ;;  %v3481_v4 = vcombine.high %v908_v60, %v924_v57  ;;  %2683 = vmatprep.subr.bf16.mxu0 %v4734_v21 }
  0xff   : > { %v4730_v13 = vld [vmem:[#allocation2 + $0x10c] ss:$16 sps:$4 sm:$0xff]  }
 0x100   : > { %5144 = vst [vmem:[#allocation18_spill] sm:$0xff] %v4730_v13  ;;  %1082 = vst.msk [vmem:[#allocation2 + $0x148] sm:$0xff] %vm4519_vm2, %v3479_v32  ;;  %v1130_v23 = vld [vmem:[#allocation2 + $0x108] sm:$0xff]  ;;  %v1132_v27 = vld [vmem:[#allocation2 + $0x118] sm:$0xff]  ;;  %3670 = vmatprep.mubr.msk.bf16.mxu1 %vm2091_vm3, %v4730_v13 }
 0x101   : > { %1084 = vst.msk [vmem:[#allocation2 + $0x158] sm:$0xff] %vm4519_vm2, %v3481_v4  ;;  %v925_v60 = vpop.trf.xlu0  ;;  %v4752_v56 = vcombine.low %v1130_v23, %v1132_v27  ;;  %v911_v13 = vpop.trf.xlu1  ;;  %2684 = vmatpush2.bf16.msra.mxu0 %v4745_v51 }
 0x102   : > { %v3483_v28 = vcombine.low %v909_v25, %v925_v60  ;;  %v3485_v57 = vcombine.high %v909_v25, %v925_v60 }
 0x103   : > { %5145 = vst [vmem:[#allocation19_spill] sm:$0xff] %v4752_v56  ;;  %2227 = vmatmul.mubr.bf16.gmra.mxu0 %v4650_v5  ;;  %v1134_v60 = vld [vmem:[#allocation2 + $0x128] sm:$0xff] }
 0x104   : > { %1086 = vst.msk [vmem:[#allocation2 + $0x168] sm:$0xff] %vm4519_vm2, %v3483_v28  ;;  %1088 = vst.msk [vmem:[#allocation2 + $0x178] sm:$0xff] %vm4519_vm2, %v3485_v57  ;;  %v4754_v4 = vld [vmem:[#allocation2 + $0x12c] ss:$16 sps:$4 sm:$0xff]  }
 0x105   : > { %v926_v32 = vpop.trf.xlu0  ;;  %5146 = vst [vmem:[#allocation20_spill] sm:$0xff] %v4754_v4  ;;  %2420 = vmatmul.mubr.bf16.gmra.mxu1 %v4752_v56  ;;  %v1136_v23 = vld [vmem:[#allocation2 + $0x138] sm:$0xff] }
 0x106   : > { %v3487_v45 = vcombine.low %v910_v16, %v926_v32  ;;  %v3489_v25 = vcombine.high %v910_v16, %v926_v32  ;;  %3671 = vmatprep.mubr.msk.bf16.mxu1 %vm2091_vm3, %v4754_v4  ;;  %v4771_v32 = vcombine.low %v1134_v60, %v1136_v23 }
 0x108   : > { %1090 = vst.msk [vmem:[#allocation2 + $0x188] sm:$0xff] %vm4519_vm2, %v3487_v45  ;;  %1092 = vst.msk [vmem:[#allocation2 + $0x198] sm:$0xff] %vm4519_vm2, %v3489_v25  ;;  %v4775_v45 = vld [vmem:[#allocation2 + $0x14c] ss:$16 sps:$4 sm:$0xff]   ;;  %v4788_v60 = vld [vmem:[#allocation2 + $0x148] ss:$16 sps:$4 sm:$0xff]  }
 0x109   : > { %v927_v27 = vpop.trf.xlu0  ;;  %v4765_v57 = vpop.trf.xlu1  ;;  %5147 = vst [vmem:[#allocation21_spill] sm:$0xff] %v4771_v32  ;;  %5148 = vst [vmem:[#allocation22_spill] sm:$0xff] %v4775_v45 }
 0x10a   : > { %v3491_v28 = vcombine.low %v911_v13, %v927_v27  ;;  %v3493_v16 = vcombine.high %v911_v13, %v927_v27  ;;  %2236 = vmatprep.mubr.bf16.mxu0 %v4765_v57  ;;  %5151 = vst [vmem:[#allocation25_spill] sm:$0xff] %v4788_v60 }
 0x10b   : > { %v4790_v23 = vld [vmem:[#allocation2 + $0x16c] ss:$16 sps:$4 sm:$0xff]  }
 0x10c   : > { %1094 = vst.msk [vmem:[#allocation2 + $0x1a8] sm:$0xff] %vm4519_vm2, %v3491_v28  ;;  %1096 = vst.msk [vmem:[#allocation2 + $0x1b8] sm:$0xff] %vm4519_vm2, %v3493_v16 }
 0x10d   : > { %v4773_v4 = vpop.trf.xlu0  ;;  %2430 = vmatmul.mubr.bf16.gmra.mxu1 %v4771_v32  ;;  %v4780_v13 = vpop.trf.xlu1  ;;  %5152 = vst [vmem:[#allocation26_spill] sm:$0xff] %v4790_v23  ;;  %v4805_v32 = vld [vmem:[#allocation2 + $0x168] ss:$16 sps:$4 sm:$0xff]  }
 0x10e   : > { %3672 = vmatprep.mubr.msk.bf16.mxu1 %vm2091_vm3, %v4775_v45  ;;  %2237 = vmatmul.mubr.bf16.gmra.mxu0 %v4773_v4 }
 0x10f   : > { %2246 = vmatprep.mubr.bf16.mxu0 %v4780_v13  ;;  %v4808_v56 = vld [vmem:[#allocation2 + $0x18c] ss:$16 sps:$4 sm:$0xff]   ;;  %v4822_v11 = vld [vmem:[#allocation2 + $0x188] ss:$16 sps:$4 sm:$0xff]  }
 0x110   : > { %5153 = vst [vmem:[#allocation27_spill] sm:$0xff] %v4808_v56 }
 0x111   : > { %v4782_v25 = vpop.trf.xlu0  ;;  %v4786_v27 = vpop.trf.xlu1 }
 0x112   : > { %5149 = vst [vmem:[#allocation23_spill] sm:$0xff] %v4782_v25  ;;  %5150 = vst [vmem:[#allocation24_spill] sm:$0xff] %v4786_v27 }
 0x115   : > { %v4792_v28 = vpop.trf.xlu0  ;;  %2440 = vmatmul.mubr.bf16.gmra.mxu1 %v4788_v60  ;;  %v4798_v16 = vpop.trf.xlu1 }
 0x116   : > { %3673 = vmatprep.mubr.msk.bf16.mxu1 %vm2091_vm3, %v4790_v23  ;;  %2247 = vmatmul.mubr.bf16.gmra.mxu0 %v4782_v25 }
 0x117   : > { %2256 = vmatprep.mubr.bf16.mxu0 %v4786_v27  ;;  %v4825_v27 = vld [vmem:[#allocation2 + $0x1ac] ss:$16 sps:$4 sm:$0xff]  }
 0x119   : > { %v4800_v38 = vpop.trf.xlu0  ;;  %v4803_v45 = vpop.trf.xlu1 }
 0x11d   : > { %v4810_v60 = vpop.trf.xlu0  ;;  %2450 = vmatmul.mubr.bf16.gmra.mxu1 %v4805_v32  ;;  %v4815_v23 = vpop.trf.xlu1 }
 0x11e   : > { %3674 = vmatprep.mubr.msk.bf16.mxu1 %vm2091_vm3, %v4808_v56  ;;  %2257 = vmatmul.mubr.bf16.gmra.mxu0 %v4792_v28  ;;  %v4833_v56 = vld [vmem:[#allocation2 + $0x1a8] ss:$16 sps:$4 sm:$0xff]  }
 0x11f   : > { %2266 = vmatprep.mubr.bf16.mxu0 %v4798_v16 }
 0x121   : > { %v4817_v22 = vpop.trf.xlu0  ;;  %v4820_v25 = vpop.trf.xlu1 }
 0x125   : > { %v4827_v6 = vpop.trf.xlu0  ;;  %2460 = vmatmul.mubr.bf16.gmra.mxu1 %v4822_v11 }
 0x126   : > { %3675 = vmatprep.mubr.msk.bf16.mxu1 %vm2091_vm3, %v4825_v27  ;;  %2267 = vmatmul.mubr.bf16.gmra.mxu0 %v4800_v38 }
 0x127   : > { %2276 = vmatprep.mubr.bf16.mxu0 %v4803_v45 }
 0x12d   : > { %2470 = vmatmul.mubr.bf16.gmra.mxu1 %v4833_v56 }
 0x12e   : > { %2512 = vmatprep.mubr.bf16.mxu1 %v4591_v35  ;;  %2277 = vmatmul.mubr.bf16.gmra.mxu0 %v4810_v60  ;;  %v5160_v35 = vld [vmem:[#allocation17_spill] sm:$0xff] }
 0x12f   : > { %2286 = vmatprep.mubr.bf16.mxu0 %v4815_v23 }
 0x135   : > { %2513 = vmatmul.mubr.bf16.vlgmr.msra.gmra.mxu1 %v4582_v30 }
 0x136   : > { %2522 = vmatprep.mubr.bf16.mxu1 %v4601_v42  ;;  %3847 = vmatpush1.bf16.msra.mxu1 %v4593_v37  ;;  %v5161_v37 = vld [vmem:[#allocation18_spill] sm:$0xff] }
 0x137   : > { %3836 = vmatprep.subr.bf16.mxu1 %v4597_v40  ;;  %2287 = vmatmul.mubr.bf16.gmra.mxu0 %v4817_v22 }
 0x138   : > { %2296 = vmatprep.mubr.bf16.mxu0 %v4820_v25 }
 0x13a   : > { %3848 = vmatpush1.bf16.msra.mxu1 %v4613_v47 }
 0x13b   : > { %3837 = vmatprep.subr.bf16.mxu1 %v4618_v49 }
 0x13d   : > { %2523 = vmatmul.mubr.bf16.gmra.mxu1 %v4589_v33 }
 0x13e   : > { %2532 = vmatprep.mubr.bf16.mxu1 %v4615_v48  ;;  %3849 = vmatpush1.bf16.msra.mxu1 %v4628_v55 }
 0x13f   : > { %3838 = vmatprep.subr.bf16.mxu1 %v4633_v59  ;;  %2297 = vmatmul.mubr.bf16.gmra.mxu0 %v4827_v6 }
 0x140   : > { %3676 = vmatprep.mubr.msk.bf16.mxu0 %vm2091_vm3, %v4545_v63  ;;  %v5155_v63 = vld [vmem:[#allocation14_spill] sm:$0xff] }
 0x142   : > { %3850 = vmatpush1.bf16.msra.mxu1 %v4645_v1 }
 0x143   : > { %3839 = vmatprep.subr.bf16.mxu1 %v4648_v3 }
 0x145   : > { %2533 = vmatmul.mubr.bf16.gmra.mxu1 %v4595_v39 }
 0x146   : > { %2542 = vmatprep.mubr.bf16.mxu1 %v4626_v54  ;;  %3851 = vmatpush1.bf16.msra.mxu1 %v4657_v9 }
 0x147   : > { %3840 = vmatprep.subr.bf16.mxu1 %v4662_v12  ;;  %2686 = vmatmul.mubr.bf16.vlgmr.msra.gmra.mxu0 %v4539_v62  ;;  %v5154_v62 = vld [vmem:[#allocation13_spill] sm:$0xff]  ;;  %v5167_v12 = vld [vmem:[#allocation26_spill] sm:$0xff] }
 0x148   : > { %3677 = vmatprep.mubr.msk.bf16.mxu0 %vm2091_vm3, %v4553_v7  ;;  %v5156_v7 = vld [vmem:[#allocation23_spill] sm:$0xff] }
 0x14a   : > { %3852 = vmatpush1.bf16.msra.mxu1 %v4672_v18 }
 0x14b   : > { %3841 = vmatprep.subr.bf16.mxu1 %v4675_v20 }
 0x14d   : > { %2543 = vmatmul.mubr.bf16.gmra.mxu1 %v4610_v46  ;;  %v5163_v46 = vld [vmem:[#allocation20_spill] sm:$0xff] }
 0x14e   : > { %2552 = vmatprep.mubr.bf16.mxu1 %v4642_v0  ;;  %3853 = vmatpush1.bf16.msra.mxu1 %v4680_v24 }
 0x14f   : > { %3842 = vmatprep.subr.bf16.mxu1 %v4683_v26  ;;  %2696 = vmatmul.mubr.bf16.gmra.mxu0 %v4561_v15  ;;  %v5157_v15 = vld [vmem:[#allocation24_spill] sm:$0xff] }
 0x150   : > { %3678 = vmatprep.mubr.msk.bf16.mxu0 %vm2091_vm3, %v4567_v17  ;;  %v5158_v17 = vld [vmem:[#allocation15_spill] sm:$0xff] }
 0x152   : > { %3854 = vmatpush1.bf16.msra.mxu1 %v4689_v34 }
 0x153   : > { %3843 = vmatprep.subr.bf16.mxu1 %v4692_v50 }
 0x155   : > { %2553 = vmatmul.mubr.bf16.gmra.mxu1 %v4621_v52 }
 0x156   : > { %2562 = vmatprep.mubr.bf16.mxu1 %v4654_v8  ;;  %3855 = vmatpush2.bf16.msra.mxu1 %v4699_v2  ;;  %v5166_v8 = vld [vmem:[#allocation25_spill] sm:$0xff] }
 0x157   : > { %3844 = vmatprep.subr.bf16.mxu1 %v4702_v19  ;;  %2706 = vmatmul.mubr.bf16.gmra.mxu0 %v4576_v29  ;;  %v5159_v29 = vld [vmem:[#allocation16_spill] sm:$0xff] }
 0x158   : > { %3679 = vmatprep.mubr.msk.bf16.mxu0 %vm2091_vm3, %v4584_v31 }
 0x15a   : > { %3856 = vmatpush2.bf16.msra.mxu1 %v4711_v36 }
 0x15b   : > { %3845 = vmatprep.subr.bf16.mxu1 %v4714_v43 }
 0x15d   : > { %2563 = vmatmul.mubr.bf16.gmra.mxu1 %v4639_v61 }
 0x15e   : > { %2572 = vmatprep.mubr.bf16.mxu1 %v4669_v14  ;;  %3857 = vmatpush2.bf16.msra.mxu1 %v4728_v10  ;;  %v5168_v10 = vld [vmem:[#allocation27_spill] sm:$0xff] }
 0x15f   : > { %3846 = vmatprep.subr.bf16.mxu1 %v4734_v21  ;;  %2716 = vmatmul.mubr.bf16.gmra.mxu0 %v4599_v41 }
 0x160   : > { %3680 = vmatprep.mubr.msk.bf16.mxu0 %vm2091_vm3, %v4603_v44  ;;  %v5162_v44 = vld [vmem:[#allocation19_spill] sm:$0xff] }
 0x162   : > { %3858 = vmatpush2.bf16.msra.mxu1 %v4745_v51 }
 0x165   : > { %2573 = vmatmul.mubr.bf16.gmra.mxu1 %v4650_v5 }
 0x166   : > { %2582 = vmatprep.mubr.bf16.mxu1 %v4765_v57 }
 0x167   : > { %2726 = vmatmul.mubr.bf16.gmra.mxu0 %v4624_v53  ;;  %v5164_v53 = vld [vmem:[#allocation21_spill] sm:$0xff] }
 0x168   : > { %3681 = vmatprep.mubr.msk.bf16.mxu0 %vm2091_vm3, %v4631_v58 }
 0x16d   : > { %2583 = vmatmul.mubr.bf16.gmra.mxu1 %v4773_v4 }
 0x16e   : > { %2592 = vmatprep.mubr.bf16.mxu1 %v4780_v13 }
 0x16f   : > { %2736 = vmatmul.mubr.bf16.gmra.mxu0 %v5154_v62 }
 0x170   : > { %3682 = vmatprep.mubr.msk.bf16.mxu0 %vm2091_vm3, %v5155_v63 }
 0x175   : > { %2593 = vmatmul.mubr.bf16.gmra.mxu1 %v5156_v7 }
 0x176   : > { %2602 = vmatprep.mubr.bf16.mxu1 %v5157_v15 }
 0x177   : > { %2746 = vmatmul.mubr.bf16.gmra.mxu0 %v5158_v17 }
 0x178   : > { %3683 = vmatprep.mubr.msk.bf16.mxu0 %vm2091_vm3, %v5159_v29 }
 0x17d   : > { %2603 = vmatmul.mubr.bf16.gmra.mxu1 %v4792_v28  ;;  %v2341_v30 = vpop.f32.mrf.mxu1 }
 0x17e   : > { %2612 = vmatprep.mubr.bf16.mxu1 %v4798_v16 }
 0x17f   : > { %v2343_v31 = vpop.f32.mrf.mxu1  ;;  %2756 = vmatmul.mubr.bf16.gmra.mxu0 %v5160_v35 }
 0x180   : > { %3684 = vmatprep.mubr.msk.bf16.mxu0 %vm2091_vm3, %v5161_v37 }
 0x181   : > { %v2345_v33 = vpop.f32.mrf.mxu1 }
 0x183   : > { %v2347_v39 = vpop.f32.mrf.mxu1 }
 0x185   : > { %2613 = vmatmul.mubr.bf16.gmra.mxu1 %v4800_v38  ;;  %v2351_v40 = vpop.f32.mrf.mxu1  ;;  %v5165_v38 = vld [vmem:[#allocation22_spill] sm:$0xff] }
 0x186   : > { %2622 = vmatprep.mubr.bf16.mxu1 %v4803_v45 }
 0x187   : > { %v2353_v41 = vpop.f32.mrf.mxu1  ;;  %2766 = vmatmul.mubr.bf16.gmra.mxu0 %v5162_v44 }
 0x188   : > { %3685 = vmatprep.mubr.msk.bf16.mxu0 %vm2091_vm3, %v5163_v46 }
 0x189   : > { %v2355_v42 = vpop.f32.mrf.mxu1 }
 0x18b   : > { %v2357_v47 = vpop.f32.mrf.mxu1 }
 0x18d   : > { %2623 = vmatmul.mubr.bf16.gmra.mxu1 %v4810_v60  ;;  %v2361_v48 = vpop.f32.mrf.mxu1 }
 0x18e   : > { %2632 = vmatprep.mubr.bf16.mxu1 %v4815_v23 }
 0x18f   : > { %v2363_v49 = vpop.f32.mrf.mxu1  ;;  %2776 = vmatmul.mubr.bf16.gmra.mxu0 %v5164_v53 }
 0x190   : > { %3686 = vmatprep.mubr.msk.bf16.mxu0 %vm2091_vm3, %v5165_v38 }
 0x191   : > { %v2365_v52 = vpop.f32.mrf.mxu1 }
 0x193   : > { %v2367_v54 = vpop.f32.mrf.mxu1  ;;  %v2168_v58 = vpop.f32.mrf.mxu0 }
 0x194   : > { %v2342_v0 = vadd.f32 %v2341_v30, %v2168_v58 }
 0x195   : > { %2633 = vmatmul.mubr.bf16.gmra.mxu1 %v4817_v22  ;;  %v2371_v55 = vpop.f32.mrf.mxu1  ;;  %v2170_v61 = vpop.f32.mrf.mxu0 }
 0x196   : > { %2642 = vmatprep.mubr.bf16.mxu1 %v4820_v25  ;;  %v2344_v1 = vadd.f32 %v2343_v31, %v2170_v61 }
 0x197   : > { %v2373_v59 = vpop.f32.mrf.mxu1  ;;  %v2172_v5 = vpop.f32.mrf.mxu0  ;;  %2786 = vmatmul.mubr.bf16.gmra.mxu0 %v5166_v8 }
 0x198   : > { %v3779_v9 = vpack.c.bf16 %v2344_v1, %v2342_v0  ;;  %3687 = vmatprep.mubr.msk.bf16.mxu0 %vm2091_vm3, %v5167_v12  ;;  %v2346_v20 = vadd.f32 %v2345_v33, %v2172_v5 }
 0x199   : > { %v2375_v3 = vpop.f32.mrf.mxu1  ;;  %v2174_v18 = vpop.f32.mrf.mxu0 }
 0x19a   : > { %2994 = vst [vmem:[%s4930_s15] sm:$0xff] %v3779_v9  ;;  %v2348_v22 = vadd.f32 %v2347_v39, %v2174_v18 }
 0x19b   : > { %v2377_v14 = vpop.f32.mrf.mxu1  ;;  %v2178_v26 = vpop.f32.mrf.mxu0 }
 0x19c   : > { %v3781_v34 = vpack.c.bf16 %v2348_v22, %v2346_v20  ;;  %v2352_v19 = vadd.f32 %v2351_v40, %v2178_v26 }
 0x19d   : > { %2643 = vmatmul.mubr.bf16.gmra.mxu1 %v4827_v6  ;;  %v2381_v24 = vpop.f32.mrf.mxu1  ;;  %v2180_v2 = vpop.f32.mrf.mxu0 }
 0x19e   : > { %3689 = vmatprep.mubr.msk.bf16.mxu1 %vm2091_vm3, %v4825_v27  ;;  %2996 = vst [vmem:[%s4930_s15 + $0x10] sm:$0xff] %v3781_v34  ;;  %v2354_v6 = vadd.f32 %v2353_v41, %v2180_v2 }
 0x19f   : > { %v2383_v50 = vpop.f32.mrf.mxu1  ;;  %v2182_v43 = vpop.f32.mrf.mxu0  ;;  %2796 = vmatmul.mubr.bf16.gmra.mxu0 %v4805_v32 }
 0x1a0   : > { %v3783_v51 = vpack.c.bf16 %v2354_v6, %v2352_v19  ;;  %3688 = vmatprep.mubr.msk.bf16.mxu0 %vm2091_vm3, %v5168_v10  ;;  %v2356_v57 = vadd.f32 %v2355_v42, %v2182_v43 }
 0x1a1   : > { %v2385_v36 = vpop.f32.mrf.mxu1  ;;  %v2184_v4 = vpop.f32.mrf.mxu0 }
 0x1a2   : > { %2998 = vst [vmem:[%s4930_s15 + $0x20] sm:$0xff] %v3783_v51  ;;  %v2358_v45 = vadd.f32 %v2357_v47, %v2184_v4 }
 0x1a3   : > { %v2387_v21 = vpop.f32.mrf.mxu1  ;;  %v2188_v25 = vpop.f32.mrf.mxu0 }
 0x1a4   : > { %v3785_v27 = vpack.c.bf16 %v2358_v45, %v2356_v57  ;;  %v2362_v32 = vadd.f32 %v2361_v48, %v2188_v25 }
 0x1a5   : > { %2816 = vmatmul.mubr.bf16.vlgmr.msra.gmra.mxu1 %v4833_v56  ;;  %v2391_v13 = vpop.f32.mrf.mxu1  ;;  %v2190_v23 = vpop.f32.mrf.mxu0 }
 0x1a6   : > { %3000 = vst [vmem:[%s4930_s15 + $0x30] sm:$0xff] %v3785_v27  ;;  %v2364_v28 = vadd.f32 %v2363_v49, %v2190_v23 }
 0x1a7   : > { %v2393_v60 = vpop.f32.mrf.mxu1  ;;  %v2192_v62 = vpop.f32.mrf.mxu0  ;;  %2806 = vmatmul.mubr.bf16.gmra.mxu0 %v4822_v11 }
 0x1a8   : > { %v3787_v63 = vpack.c.bf16 %v2364_v28, %v2362_v32  ;;  %v2366_v15 = vadd.f32 %v2365_v52, %v2192_v62 }
 0x1a9   : > { %v2395_v16 = vpop.f32.mrf.mxu1  ;;  %v2194_v56 = vpop.f32.mrf.mxu0 }
 0x1aa   : > { %3002 = vst [vmem:[%s4930_s15 + $0x40] sm:$0xff] %v3787_v63  ;;  %v2368_v17 = vadd.f32 %v2367_v54, %v2194_v56 }
 0x1ab   : > { %v2397_v7 = vpop.f32.mrf.mxu1  ;;  %v2198_v29 = vpop.f32.mrf.mxu0 }
 0x1ac   : > { %v3789_v31 = vpack.c.bf16 %v2368_v17, %v2366_v15  ;;  %v2372_v35 = vadd.f32 %v2371_v55, %v2198_v29 }
 0x1ad   : > { %v2401_v30 = vpop.f32.mrf.mxu1  ;;  %v2200_v33 = vpop.f32.mrf.mxu0 }
 0x1ae   : > { %3004 = vst [vmem:[%s4930_s15 + $0x50] sm:$0xff] %v3789_v31  ;;  %v2374_v37 = vadd.f32 %v2373_v59, %v2200_v33 }
 0x1af   : > { %v2202_v39 = vpop.f32.mrf.mxu0  ;;  %v2403_v40 = vpop.f32.mrf.mxu1 }
 0x1b0   : > { %v3791_v41 = vpack.c.bf16 %v2374_v37, %v2372_v35  ;;  %v2376_v11 = vadd.f32 %v2375_v3, %v2202_v39 }
 0x1b1   : > { %v2204_v42 = vpop.f32.mrf.mxu0  ;;  %v2405_v47 = vpop.f32.mrf.mxu1 }
 0x1b2   : > { %3006 = vst [vmem:[%s4930_s15 + $0x60] sm:$0xff] %v3791_v41  ;;  %v2378_v44 = vadd.f32 %v2377_v14, %v2204_v42 }
 0x1b3   : > { %v2208_v46 = vpop.f32.mrf.mxu0  ;;  %v2407_v54 = vpop.f32.mrf.mxu1 }
 0x1b4   : > { %v3793_v48 = vpack.c.bf16 %v2378_v44, %v2376_v11  ;;  %v2382_v52 = vadd.f32 %v2381_v24, %v2208_v46 }
 0x1b5   : > { %v2210_v49 = vpop.f32.mrf.mxu0 }
 0x1b6   : > { %3008 = vst [vmem:[%s4930_s15 + $0x70] sm:$0xff] %v3793_v48  ;;  %v2384_v53 = vadd.f32 %v2383_v50, %v2210_v49 }
 0x1b7   : > { %v2212_v38 = vpop.f32.mrf.mxu0 }
 0x1b8   : > { %v3795_v55 = vpack.c.bf16 %v2384_v53, %v2382_v52  ;;  %v2386_v61 = vadd.f32 %v2385_v36, %v2212_v38 }
 0x1b9   : > { %v2214_v58 = vpop.f32.mrf.mxu0 }
 0x1ba   : > { %3010 = vst [vmem:[%s4930_s15 + $0x80] sm:$0xff] %v3795_v55  ;;  %v2388_v0 = vadd.f32 %v2387_v21, %v2214_v58 }
 0x1bb   : > { %v2218_v1 = vpop.f32.mrf.mxu0 }
 0x1bc   : > { %v3797_v5 = vpack.c.bf16 %v2388_v0, %v2386_v61  ;;  %v2392_v12 = vadd.f32 %v2391_v13, %v2218_v1 }
 0x1bd   : > { %v2411_v59 = vpop.f32.mrf.mxu1  ;;  %v2220_v8 = vpop.f32.mrf.mxu0 }
 0x1be   : > { %3012 = vst [vmem:[%s4930_s15 + $0x90] sm:$0xff] %v3797_v5  ;;  %v2394_v14 = vadd.f32 %v2393_v60, %v2220_v8 }
 0x1bf   : > { %v2413_v3 = vpop.f32.mrf.mxu1  ;;  %v2222_v18 = vpop.f32.mrf.mxu0 }
 0x1c0   : > { %v3799_v22 = vpack.c.bf16 %v2394_v14, %v2392_v12  ;;  %v2396_v34 = vadd.f32 %v2395_v16, %v2222_v18 }
 0x1c1   : > { %v2415_v9 = vpop.f32.mrf.mxu1  ;;  %v2224_v24 = vpop.f32.mrf.mxu0 }
 0x1c2   : > { %3014 = vst [vmem:[%s4930_s15 + $0xa0] sm:$0xff] %v3799_v22  ;;  %v2398_v50 = vadd.f32 %v2397_v7, %v2224_v24 }
 0x1c3   : > { %v2417_v20 = vpop.f32.mrf.mxu1  ;;  %v2228_v2 = vpop.f32.mrf.mxu0 }
 0x1c4   : > { %v3801_v6 = vpack.c.bf16 %v2398_v50, %v2396_v34  ;;  %v2402_v51 = vadd.f32 %v2401_v30, %v2228_v2 }
 0x1c5   : > { %v2421_v26 = vpop.f32.mrf.mxu1  ;;  %v2230_v36 = vpop.f32.mrf.mxu0 }
 0x1c6   : > { %3016 = vst [vmem:[%s4930_s15 + $0xb0] sm:$0xff] %v3801_v6  ;;  %v2404_v10 = vadd.f32 %v2403_v40, %v2230_v36 }
 0x1c7   : > { %v2423_v19 = vpop.f32.mrf.mxu1  ;;  %v2232_v21 = vpop.f32.mrf.mxu0 }
 0x1c8   : > { %v3803_v57 = vpack.c.bf16 %v2404_v10, %v2402_v51  ;;  %v2406_v25 = vadd.f32 %v2405_v47, %v2232_v21 }
 0x1c9   : > { %v2425_v43 = vpop.f32.mrf.mxu1  ;;  %v2234_v45 = vpop.f32.mrf.mxu0 }
 0x1ca   : > { %3018 = vst [vmem:[%s4930_s15 + $0xc0] sm:$0xff] %v3803_v57  ;;  %v2408_v27 = vadd.f32 %v2407_v54, %v2234_v45 }
 0x1cb   : > { %v2427_v4 = vpop.f32.mrf.mxu1 }
 0x1cc   : > { %v3805_v23 = vpack.c.bf16 %v2408_v27, %v2406_v25 }
 0x1cd   : > { %v2431_v13 = vpop.f32.mrf.mxu1 }
 0x1ce   : > { %3020 = vst [vmem:[%s4930_s15 + $0xd0] sm:$0xff] %v3805_v23  ;;  %v2238_v28 = vpop.f32.mrf.mxu0 }
 0x1cf   : > { %v2433_v60 = vpop.f32.mrf.mxu1  ;;  %v2412_v7 = vadd.f32 %v2411_v59, %v2238_v28 }
 0x1d0   : > { %v2240_v62 = vpop.f32.mrf.mxu0 }
 0x1d1   : > { %v2435_v32 = vpop.f32.mrf.mxu1  ;;  %v2414_v56 = vadd.f32 %v2413_v3, %v2240_v62 }
 0x1d2   : > { %v2242_v15 = vpop.f32.mrf.mxu0 }
 0x1d3   : > { %v2437_v16 = vpop.f32.mrf.mxu1  ;;  %v3807_v29 = vpack.c.bf16 %v2414_v56, %v2412_v7  ;;  %v2416_v33 = vadd.f32 %v2415_v9, %v2242_v15 }
 0x1d4   : > { %v2244_v30 = vpop.f32.mrf.mxu0 }
 0x1d5   : > { %v2441_v63 = vpop.f32.mrf.mxu1  ;;  %3746 = vst [vmem:[%s4930_s15 + $0xe0] sm:$0xff] %v3807_v29  ;;  %v2418_v35 = vadd.f32 %v2417_v20, %v2244_v30 }
 0x1d6   : > { %v2248_v37 = vpop.f32.mrf.mxu0 }
 0x1d7   : > { %v2443_v17 = vpop.f32.mrf.mxu1  ;;  %v3809_v40 = vpack.c.bf16 %v2418_v35, %v2416_v33  ;;  %v2422_v11 = vadd.f32 %v2421_v26, %v2248_v37 }
 0x1d8   : > { %v2250_v41 = vpop.f32.mrf.mxu0 }
 0x1d9   : > { %v2445_v31 = vpop.f32.mrf.mxu1  ;;  %3748 = vst [vmem:[%s4930_s15 + $0xf0] sm:$0xff] %v3809_v40  ;;  %v2424_v44 = vadd.f32 %v2423_v19, %v2250_v41 }
 0x1da   : > { %v2252_v46 = vpop.f32.mrf.mxu0 }
 0x1db   : > { %v2447_v39 = vpop.f32.mrf.mxu1  ;;  %v3811_v48 = vpack.c.bf16 %v2424_v44, %v2422_v11  ;;  %v2426_v53 = vadd.f32 %v2425_v43, %v2252_v46 }
 0x1dc   : > { %v2254_v49 = vpop.f32.mrf.mxu0 }
 0x1dd   : > { %v2451_v42 = vpop.f32.mrf.mxu1  ;;  %3750 = vst [vmem:[%s4930_s15 + $0x100] sm:$0xff] %v3811_v48  ;;  %v2428_v38 = vadd.f32 %v2427_v4, %v2254_v49 }
 0x1de   : > { %v2258_v54 = vpop.f32.mrf.mxu0 }
 0x1df   : > { %v2453_v47 = vpop.f32.mrf.mxu1  ;;  %v3813_v58 = vpack.c.bf16 %v2428_v38, %v2426_v53  ;;  %v2432_v0 = vadd.f32 %v2431_v13, %v2258_v54 }
 0x1e0   : > { %v2260_v59 = vpop.f32.mrf.mxu0 }
 0x1e1   : > { %v2455_v52 = vpop.f32.mrf.mxu1  ;;  %3752 = vst [vmem:[%s4930_s15 + $0x110] sm:$0xff] %v3813_v58  ;;  %v2434_v1 = vadd.f32 %v2433_v60, %v2260_v59 }
 0x1e2   : > { %v2262_v3 = vpop.f32.mrf.mxu0 }
 0x1e3   : > { %v2457_v55 = vpop.f32.mrf.mxu1  ;;  %v3815_v8 = vpack.c.bf16 %v2434_v1, %v2432_v0  ;;  %v2436_v14 = vadd.f32 %v2435_v32, %v2262_v3 }
 0x1e4   : > { %v2264_v9 = vpop.f32.mrf.mxu0 }
 0x1e5   : > { %v2461_v61 = vpop.f32.mrf.mxu1  ;;  %3754 = vst [vmem:[%s4930_s15 + $0x120] sm:$0xff] %v3815_v8  ;;  %v2438_v18 = vadd.f32 %v2437_v16, %v2264_v9 }
 0x1e6   : > { %v2268_v20 = vpop.f32.mrf.mxu0 }
 0x1e7   : > { %v2463_v5 = vpop.f32.mrf.mxu1  ;;  %v3817_v24 = vpack.c.bf16 %v2438_v18, %v2436_v14  ;;  %v2442_v50 = vadd.f32 %v2441_v63, %v2268_v20 }
 0x1e8   : > { %v2270_v26 = vpop.f32.mrf.mxu0 }
 0x1e9   : > { %v2465_v12 = vpop.f32.mrf.mxu1  ;;  %3756 = vst [vmem:[%s4930_s15 + $0x130] sm:$0xff] %v3817_v24  ;;  %v2444_v2 = vadd.f32 %v2443_v17, %v2270_v26 }
 0x1ea   : > { %v2272_v19 = vpop.f32.mrf.mxu0 }
 0x1eb   : > { %v2467_v22 = vpop.f32.mrf.mxu1  ;;  %v3819_v36 = vpack.c.bf16 %v2444_v2, %v2442_v50  ;;  %v2446_v10 = vadd.f32 %v2445_v31, %v2272_v19 }
 0x1ec   : > { %v2274_v43 = vpop.f32.mrf.mxu0 }
 0x1ed   : > { %v2471_v34 = vpop.f32.mrf.mxu1  ;;  %3758 = vst [vmem:[%s4930_s15 + $0x140] sm:$0xff] %v3819_v36  ;;  %v2448_v21 = vadd.f32 %v2447_v39, %v2274_v43 }
 0x1ee   : > { %v2278_v4 = vpop.f32.mrf.mxu0 }
 0x1ef   : > { %v2473_v6 = vpop.f32.mrf.mxu1  ;;  %v3821_v45 = vpack.c.bf16 %v2448_v21, %v2446_v10  ;;  %v2452_v27 = vadd.f32 %v2451_v42, %v2278_v4 }
 0x1f0   : > { %v2280_v13 = vpop.f32.mrf.mxu0 }
 0x1f1   : > { %v2475_v51 = vpop.f32.mrf.mxu1  ;;  %3760 = vst [vmem:[%s4930_s15 + $0x150] sm:$0xff] %v3821_v45  ;;  %v2454_v60 = vadd.f32 %v2453_v47, %v2280_v13 }
 0x1f2   : > { %v2282_v23 = vpop.f32.mrf.mxu0 }
 0x1f3   : > { %v2477_v57 = vpop.f32.mrf.mxu1  ;;  %v3823_v28 = vpack.c.bf16 %v2454_v60, %v2452_v27  ;;  %v2456_v63 = vadd.f32 %v2455_v52, %v2282_v23 }
 0x1f4   : > { %v2284_v16 = vpop.f32.mrf.mxu0 }
 0x1f5   : > { %v2514_v25 = vpop.f32.mrf.mxu1  ;;  %3762 = vst [vmem:[%s4930_s15 + $0x160] sm:$0xff] %v3823_v28  ;;  %v2458_v7 = vadd.f32 %v2457_v55, %v2284_v16 }
 0x1f7   : > { %v2516_v32 = vpop.f32.mrf.mxu1  ;;  %v2288_v56 = vpop.f32.mrf.mxu0  ;;  %v3825_v17 = vpack.c.bf16 %v2458_v7, %v2456_v63 }
 0x1f8   : > { %v2462_v31 = vadd.f32 %v2461_v61, %v2288_v56 }
 0x1f9   : > { %v2518_v62 = vpop.f32.mrf.mxu1  ;;  %v2290_v29 = vpop.f32.mrf.mxu0  ;;  %3764 = vst [vmem:[%s4930_s15 + $0x170] sm:$0xff] %v3825_v17 }
 0x1fa   : > { %v2464_v33 = vadd.f32 %v2463_v5, %v2290_v29 }
 0x1fb   : > { %v2520_v15 = vpop.f32.mrf.mxu1  ;;  %v2292_v35 = vpop.f32.mrf.mxu0 }
 0x1fc   : > { %v3827_v39 = vpack.c.bf16 %v2464_v33, %v2462_v31  ;;  %v2466_v42 = vadd.f32 %v2465_v12, %v2292_v35 }
 0x1fd   : > { %v2524_v30 = vpop.f32.mrf.mxu1  ;;  %v2294_v40 = vpop.f32.mrf.mxu0 }
 0x1fe   : > { %3766 = vst [vmem:[%s4930_s15 + $0x180] sm:$0xff] %v3827_v39  ;;  %v2468_v11 = vadd.f32 %v2467_v22, %v2294_v40 }
 0x1ff   : > { %v2526_v37 = vpop.f32.mrf.mxu1  ;;  %v2298_v44 = vpop.f32.mrf.mxu0 }
 0x200   : > { %v3829_v47 = vpack.c.bf16 %v2468_v11, %v2466_v42  ;;  %v2472_v52 = vadd.f32 %v2471_v34, %v2298_v44 }
 0x201   : > { %v2528_v41 = vpop.f32.mrf.mxu1  ;;  %v2300_v48 = vpop.f32.mrf.mxu0 }
 0x202   : > { %3768 = vst [vmem:[%s4930_s15 + $0x190] sm:$0xff] %v3829_v47  ;;  %v2474_v53 = vadd.f32 %v2473_v6, %v2300_v48 }
 0x203   : > { %v2530_v46 = vpop.f32.mrf.mxu1  ;;  %v2302_v38 = vpop.f32.mrf.mxu0 }
 0x204   : > { %v3831_v55 = vpack.c.bf16 %v2474_v53, %v2472_v52  ;;  %v2476_v61 = vadd.f32 %v2475_v51, %v2302_v38 }
 0x205   : > { %v2534_v49 = vpop.f32.mrf.mxu1  ;;  %v2304_v58 = vpop.f32.mrf.mxu0 }
 0x206   : > { %3770 = vst [vmem:[%s4930_s15 + $0x1a0] sm:$0xff] %v3831_v55  ;;  %v2478_v0 = vadd.f32 %v2477_v57, %v2304_v58 }
 0x207   : > { %v2536_v54 = vpop.f32.mrf.mxu1  ;;  %v2687_v1 = vpop.f32.mrf.mxu0 }
 0x208   : > { %v3833_v5 = vpack.c.bf16 %v2478_v0, %v2476_v61  ;;  %v2688_v12 = vadd.f32 %v2687_v1, %v2514_v25 }
 0x209   : > { %v2538_v59 = vpop.f32.mrf.mxu1  ;;  %v2689_v8 = vpop.f32.mrf.mxu0 }
 0x20a   : > { %3772 = vst [vmem:[%s4930_s15 + $0x1b0] sm:$0xff] %v3833_v5  ;;  %v2690_v14 = vadd.f32 %v2689_v8, %v2516_v32 }
 0x20b   : > { %v2540_v3 = vpop.f32.mrf.mxu1  ;;  %v2691_v18 = vpop.f32.mrf.mxu0 }
 0x20c   : > { %v3780_v22 = vpack.c.bf16 %v2690_v14, %v2688_v12  ;;  %v2692_v50 = vadd.f32 %v2691_v18, %v2518_v62 }
 0x20d   : > { %v2544_v9 = vpop.f32.mrf.mxu1  ;;  %v2693_v24 = vpop.f32.mrf.mxu0 }
 0x20e   : > { %2995 = vst.msk [vmem:[%s4930_s15 + $0x8] sm:$0xff] %vm4519_vm2, %v3780_v22  ;;  %v2694_v2 = vadd.f32 %v2693_v24, %v2520_v15 }
 0x20f   : > { %v2546_v20 = vpop.f32.mrf.mxu1  ;;  %v2697_v19 = vpop.f32.mrf.mxu0 }
 0x210   : > { %v3782_v36 = vpack.c.bf16 %v2694_v2, %v2692_v50  ;;  %v2698_v10 = vadd.f32 %v2697_v19, %v2524_v30 }
 0x211   : > { %v2548_v26 = vpop.f32.mrf.mxu1  ;;  %v2699_v43 = vpop.f32.mrf.mxu0 }
 0x212   : > { %2997 = vst.msk [vmem:[%s4930_s15 + $0x18] sm:$0xff] %vm4519_vm2, %v3782_v36  ;;  %v2700_v21 = vadd.f32 %v2699_v43, %v2526_v37 }
 0x213   : > { %v2550_v6 = vpop.f32.mrf.mxu1  ;;  %v2701_v4 = vpop.f32.mrf.mxu0 }
 0x214   : > { %v3784_v45 = vpack.c.bf16 %v2700_v21, %v2698_v10  ;;  %v2702_v27 = vadd.f32 %v2701_v4, %v2528_v41 }
 0x215   : > { %v2554_v51 = vpop.f32.mrf.mxu1  ;;  %v2703_v13 = vpop.f32.mrf.mxu0 }
 0x216   : > { %2999 = vst.msk [vmem:[%s4930_s15 + $0x28] sm:$0xff] %vm4519_vm2, %v3784_v45  ;;  %v2704_v60 = vadd.f32 %v2703_v13, %v2530_v46 }
 0x217   : > { %v2556_v57 = vpop.f32.mrf.mxu1  ;;  %v2707_v23 = vpop.f32.mrf.mxu0 }
 0x218   : > { %v3786_v28 = vpack.c.bf16 %v2704_v60, %v2702_v27  ;;  %v2708_v63 = vadd.f32 %v2707_v23, %v2534_v49 }
 0x219   : > { %v2558_v25 = vpop.f32.mrf.mxu1  ;;  %v2709_v16 = vpop.f32.mrf.mxu0 }
 0x21a   : > { %3001 = vst.msk [vmem:[%s4930_s15 + $0x38] sm:$0xff] %vm4519_vm2, %v3786_v28  ;;  %v2710_v7 = vadd.f32 %v2709_v16, %v2536_v54 }
 0x21b   : > { %v2560_v32 = vpop.f32.mrf.mxu1  ;;  %v2711_v56 = vpop.f32.mrf.mxu0 }
 0x21c   : > { %v3788_v17 = vpack.c.bf16 %v2710_v7, %v2708_v63  ;;  %v2712_v31 = vadd.f32 %v2711_v56, %v2538_v59 }
 0x21d   : > { %v2564_v62 = vpop.f32.mrf.mxu1  ;;  %v2713_v29 = vpop.f32.mrf.mxu0 }
 0x21e   : > { %3003 = vst.msk [vmem:[%s4930_s15 + $0x48] sm:$0xff] %vm4519_vm2, %v3788_v17  ;;  %v2714_v33 = vadd.f32 %v2713_v29, %v2540_v3 }
 0x21f   : > { %v2566_v15 = vpop.f32.mrf.mxu1  ;;  %v2717_v35 = vpop.f32.mrf.mxu0 }
 0x220   : > { %v3790_v39 = vpack.c.bf16 %v2714_v33, %v2712_v31  ;;  %v2718_v42 = vadd.f32 %v2717_v35, %v2544_v9 }
 0x221   : > { %v2568_v30 = vpop.f32.mrf.mxu1  ;;  %v2719_v40 = vpop.f32.mrf.mxu0 }
 0x222   : > { %3005 = vst.msk [vmem:[%s4930_s15 + $0x58] sm:$0xff] %vm4519_vm2, %v3790_v39  ;;  %v2720_v11 = vadd.f32 %v2719_v40, %v2546_v20 }
 0x223   : > { %v2570_v37 = vpop.f32.mrf.mxu1  ;;  %v2721_v44 = vpop.f32.mrf.mxu0 }
 0x224   : > { %v3792_v47 = vpack.c.bf16 %v2720_v11, %v2718_v42  ;;  %v2722_v52 = vadd.f32 %v2721_v44, %v2548_v26 }
 0x225   : > { %v2574_v41 = vpop.f32.mrf.mxu1  ;;  %v2723_v48 = vpop.f32.mrf.mxu0 }
 0x226   : > { %3007 = vst.msk [vmem:[%s4930_s15 + $0x68] sm:$0xff] %vm4519_vm2, %v3792_v47  ;;  %v2724_v53 = vadd.f32 %v2723_v48, %v2550_v6 }
 0x227   : > { %v2576_v46 = vpop.f32.mrf.mxu1  ;;  %v2727_v38 = vpop.f32.mrf.mxu0 }
 0x228   : > { %v3794_v55 = vpack.c.bf16 %v2724_v53, %v2722_v52  ;;  %v2728_v61 = vadd.f32 %v2727_v38, %v2554_v51 }
 0x229   : > { %v2578_v49 = vpop.f32.mrf.mxu1  ;;  %v2729_v58 = vpop.f32.mrf.mxu0 }
 0x22a   : > { %3009 = vst.msk [vmem:[%s4930_s15 + $0x78] sm:$0xff] %vm4519_vm2, %v3794_v55  ;;  %v2730_v0 = vadd.f32 %v2729_v58, %v2556_v57 }
 0x22b   : > { %v2580_v54 = vpop.f32.mrf.mxu1  ;;  %v2731_v1 = vpop.f32.mrf.mxu0 }
 0x22c   : > { %v3796_v5 = vpack.c.bf16 %v2730_v0, %v2728_v61  ;;  %v2732_v12 = vadd.f32 %v2731_v1, %v2558_v25 }
 0x22d   : > { %v2584_v59 = vpop.f32.mrf.mxu1  ;;  %v2733_v8 = vpop.f32.mrf.mxu0 }
 0x22e   : > { %3011 = vst.msk [vmem:[%s4930_s15 + $0x88] sm:$0xff] %vm4519_vm2, %v3796_v5  ;;  %v2734_v14 = vadd.f32 %v2733_v8, %v2560_v32 }
 0x22f   : > { %v2586_v3 = vpop.f32.mrf.mxu1  ;;  %v2737_v18 = vpop.f32.mrf.mxu0 }
 0x230   : > { %v3798_v22 = vpack.c.bf16 %v2734_v14, %v2732_v12  ;;  %v2738_v50 = vadd.f32 %v2737_v18, %v2564_v62 }
 0x231   : > { %v2588_v9 = vpop.f32.mrf.mxu1  ;;  %v2739_v24 = vpop.f32.mrf.mxu0 }
 0x232   : > { %3013 = vst.msk [vmem:[%s4930_s15 + $0x98] sm:$0xff] %vm4519_vm2, %v3798_v22  ;;  %v2740_v2 = vadd.f32 %v2739_v24, %v2566_v15 }
 0x233   : > { %v2590_v20 = vpop.f32.mrf.mxu1  ;;  %v2741_v19 = vpop.f32.mrf.mxu0 }
 0x234   : > { %v3800_v36 = vpack.c.bf16 %v2740_v2, %v2738_v50  ;;  %v2742_v10 = vadd.f32 %v2741_v19, %v2568_v30 }
 0x235   : > { %v2594_v26 = vpop.f32.mrf.mxu1  ;;  %v2743_v43 = vpop.f32.mrf.mxu0 }
 0x236   : > { %3015 = vst.msk [vmem:[%s4930_s15 + $0xa8] sm:$0xff] %vm4519_vm2, %v3800_v36  ;;  %v2744_v21 = vadd.f32 %v2743_v43, %v2570_v37 }
 0x237   : > { %v2596_v6 = vpop.f32.mrf.mxu1  ;;  %v2747_v4 = vpop.f32.mrf.mxu0 }
 0x238   : > { %v3802_v45 = vpack.c.bf16 %v2744_v21, %v2742_v10  ;;  %v2748_v27 = vadd.f32 %v2747_v4, %v2574_v41 }
 0x239   : > { %v2598_v51 = vpop.f32.mrf.mxu1  ;;  %v2749_v13 = vpop.f32.mrf.mxu0 }
 0x23a   : > { %3017 = vst.msk [vmem:[%s4930_s15 + $0xb8] sm:$0xff] %vm4519_vm2, %v3802_v45  ;;  %v2750_v60 = vadd.f32 %v2749_v13, %v2576_v46 }
 0x23b   : > { %v2600_v57 = vpop.f32.mrf.mxu1  ;;  %v2751_v23 = vpop.f32.mrf.mxu0 }
 0x23c   : > { %v3804_v28 = vpack.c.bf16 %v2750_v60, %v2748_v27  ;;  %v2752_v63 = vadd.f32 %v2751_v23, %v2578_v49 }
 0x23d   : > { %v2604_v25 = vpop.f32.mrf.mxu1  ;;  %v2753_v16 = vpop.f32.mrf.mxu0 }
 0x23e   : > { %3019 = vst.msk [vmem:[%s4930_s15 + $0xc8] sm:$0xff] %vm4519_vm2, %v3804_v28  ;;  %v2754_v7 = vadd.f32 %v2753_v16, %v2580_v54 }
 0x23f   : > { %v2606_v32 = vpop.f32.mrf.mxu1  ;;  %v2757_v56 = vpop.f32.mrf.mxu0 }
 0x240   : > { %v3806_v17 = vpack.c.bf16 %v2754_v7, %v2752_v63  ;;  %v2758_v31 = vadd.f32 %v2757_v56, %v2584_v59 }
 0x241   : > { %v2608_v62 = vpop.f32.mrf.mxu1  ;;  %v2759_v29 = vpop.f32.mrf.mxu0 }
 0x242   : > { %3021 = vst.msk [vmem:[%s4930_s15 + $0xd8] sm:$0xff] %vm4519_vm2, %v3806_v17  ;;  %v2760_v33 = vadd.f32 %v2759_v29, %v2586_v3 }
 0x243   : > { %v2610_v15 = vpop.f32.mrf.mxu1  ;;  %v2761_v35 = vpop.f32.mrf.mxu0 }
 0x244   : > { %v3808_v39 = vpack.c.bf16 %v2760_v33, %v2758_v31  ;;  %v2762_v42 = vadd.f32 %v2761_v35, %v2588_v9 }
 0x245   : > { %v2614_v30 = vpop.f32.mrf.mxu1  ;;  %v2763_v40 = vpop.f32.mrf.mxu0 }
 0x246   : > { %3747 = vst.msk [vmem:[%s4930_s15 + $0xe8] sm:$0xff] %vm4519_vm2, %v3808_v39  ;;  %v2764_v11 = vadd.f32 %v2763_v40, %v2590_v20 }
 0x247   : > { %v2616_v37 = vpop.f32.mrf.mxu1  ;;  %v2767_v44 = vpop.f32.mrf.mxu0 }
 0x248   : > { %v3810_v47 = vpack.c.bf16 %v2764_v11, %v2762_v42  ;;  %v2768_v52 = vadd.f32 %v2767_v44, %v2594_v26 }
 0x249   : > { %v2618_v41 = vpop.f32.mrf.mxu1  ;;  %v2769_v48 = vpop.f32.mrf.mxu0 }
 0x24a   : > { %3749 = vst.msk [vmem:[%s4930_s15 + $0xf8] sm:$0xff] %vm4519_vm2, %v3810_v47  ;;  %v2770_v53 = vadd.f32 %v2769_v48, %v2596_v6 }
 0x24b   : > { %v2620_v46 = vpop.f32.mrf.mxu1  ;;  %v2771_v38 = vpop.f32.mrf.mxu0 }
 0x24c   : > { %v3812_v55 = vpack.c.bf16 %v2770_v53, %v2768_v52  ;;  %v2772_v61 = vadd.f32 %v2771_v38, %v2598_v51 }
 0x24d   : > { %v2624_v49 = vpop.f32.mrf.mxu1  ;;  %v2773_v58 = vpop.f32.mrf.mxu0 }
 0x24e   : > { %3751 = vst.msk [vmem:[%s4930_s15 + $0x108] sm:$0xff] %vm4519_vm2, %v3812_v55  ;;  %v2774_v0 = vadd.f32 %v2773_v58, %v2600_v57 }
 0x24f   : > { %v2626_v54 = vpop.f32.mrf.mxu1  ;;  %v2777_v1 = vpop.f32.mrf.mxu0 }
 0x250   : > { %v3814_v5 = vpack.c.bf16 %v2774_v0, %v2772_v61  ;;  %v2778_v12 = vadd.f32 %v2777_v1, %v2604_v25 }
 0x251   : > { %v2628_v59 = vpop.f32.mrf.mxu1  ;;  %v2779_v8 = vpop.f32.mrf.mxu0 }
 0x252   : > { %3753 = vst.msk [vmem:[%s4930_s15 + $0x118] sm:$0xff] %vm4519_vm2, %v3814_v5  ;;  %v2780_v14 = vadd.f32 %v2779_v8, %v2606_v32 }
 0x253   : > { %v2630_v3 = vpop.f32.mrf.mxu1  ;;  %v2781_v18 = vpop.f32.mrf.mxu0 }
 0x254   : > { %v3816_v22 = vpack.c.bf16 %v2780_v14, %v2778_v12  ;;  %v2782_v50 = vadd.f32 %v2781_v18, %v2608_v62 }
 0x255   : > { %v2634_v9 = vpop.f32.mrf.mxu1  ;;  %v2783_v24 = vpop.f32.mrf.mxu0 }
 0x256   : > { %3755 = vst.msk [vmem:[%s4930_s15 + $0x128] sm:$0xff] %vm4519_vm2, %v3816_v22  ;;  %v2784_v2 = vadd.f32 %v2783_v24, %v2610_v15 }
 0x257   : > { %v2636_v20 = vpop.f32.mrf.mxu1  ;;  %v2787_v19 = vpop.f32.mrf.mxu0 }
 0x258   : > { %v3818_v36 = vpack.c.bf16 %v2784_v2, %v2782_v50  ;;  %v2788_v10 = vadd.f32 %v2787_v19, %v2614_v30 }
 0x259   : > { %v2638_v26 = vpop.f32.mrf.mxu1  ;;  %v2789_v43 = vpop.f32.mrf.mxu0 }
 0x25a   : > { %3757 = vst.msk [vmem:[%s4930_s15 + $0x138] sm:$0xff] %vm4519_vm2, %v3818_v36  ;;  %v2790_v21 = vadd.f32 %v2789_v43, %v2616_v37 }
 0x25b   : > { %v2640_v6 = vpop.f32.mrf.mxu1  ;;  %v2791_v4 = vpop.f32.mrf.mxu0 }
 0x25c   : > { %v3820_v45 = vpack.c.bf16 %v2790_v21, %v2788_v10  ;;  %v2792_v27 = vadd.f32 %v2791_v4, %v2618_v41 }
 0x25d   : > { %v2644_v51 = vpop.f32.mrf.mxu1  ;;  %v2793_v13 = vpop.f32.mrf.mxu0 }
 0x25e   : > { %3759 = vst.msk [vmem:[%s4930_s15 + $0x148] sm:$0xff] %vm4519_vm2, %v3820_v45  ;;  %v2794_v60 = vadd.f32 %v2793_v13, %v2620_v46 }
 0x25f   : > { %v2646_v57 = vpop.f32.mrf.mxu1  ;;  %v2797_v23 = vpop.f32.mrf.mxu0 }
 0x260   : > { %v3822_v28 = vpack.c.bf16 %v2794_v60, %v2792_v27  ;;  %v2798_v63 = vadd.f32 %v2797_v23, %v2624_v49 }
 0x261   : > { %v2648_v25 = vpop.f32.mrf.mxu1  ;;  %v2799_v16 = vpop.f32.mrf.mxu0 }
 0x262   : > { %3761 = vst.msk [vmem:[%s4930_s15 + $0x158] sm:$0xff] %vm4519_vm2, %v3822_v28  ;;  %v2800_v7 = vadd.f32 %v2799_v16, %v2626_v54 }
 0x263   : > { %v2650_v32 = vpop.f32.mrf.mxu1  ;;  %v2801_v56 = vpop.f32.mrf.mxu0 }
 0x264   : > { %v3824_v17 = vpack.c.bf16 %v2800_v7, %v2798_v63  ;;  %v2802_v35 = vadd.f32 %v2801_v56, %v2628_v59 }
 0x265   : > { %v2817_v62 = vpop.f32.mrf.mxu1  ;;  %v2803_v31 = vpop.f32.mrf.mxu0 }
 0x266   : > { %v2818_v29 = vadd.f32 %v2817_v62, %v2644_v51  ;;  %3763 = vst.msk [vmem:[%s4930_s15 + $0x168] sm:$0xff] %vm4519_vm2, %v3824_v17  ;;  %v2804_v37 = vadd.f32 %v2803_v31, %v2630_v3 }
 0x267   : > { %v2819_v15 = vpop.f32.mrf.mxu1  ;;  %v2807_v40 = vpop.f32.mrf.mxu0 }
 0x268   : > { %v2820_v30 = vadd.f32 %v2819_v15, %v2646_v57  ;;  %v3826_v42 = vpack.c.bf16 %v2804_v37, %v2802_v35  ;;  %v2808_v47 = vadd.f32 %v2807_v40, %v2634_v9 }
 0x269   : > { %v2821_v33 = vpop.f32.mrf.mxu1  ;;  %v2809_v46 = vpop.f32.mrf.mxu0 }
 0x26a   : > { %v3832_v39 = vpack.c.bf16 %v2820_v30, %v2818_v29  ;;  %v2822_v11 = vadd.f32 %v2821_v33, %v2648_v25  ;;  %3765 = vst.msk [vmem:[%s4930_s15 + $0x178] sm:$0xff] %vm4519_vm2, %v3826_v42  ;;  %v2810_v48 = vadd.f32 %v2809_v46, %v2636_v20 }
 0x26b   : > { %v2823_v41 = vpop.f32.mrf.mxu1  ;;  %v2811_v52 = vpop.f32.mrf.mxu0 }
 0x26c   : > { %3771 = vst.msk [vmem:[%s4930_s15 + $0x1a8] sm:$0xff] %vm4519_vm2, %v3832_v39  ;;  %v2824_v44 = vadd.f32 %v2823_v41, %v2650_v32  ;;  %v3828_v53 = vpack.c.bf16 %v2810_v48, %v2808_v47  ;;  %v2812_v54 = vadd.f32 %v2811_v52, %v2638_v26 }
 0x26d   : > { %v2813_v38 = vpop.f32.mrf.mxu0 }
 0x26e   : > { %v3834_v49 = vpack.c.bf16 %v2824_v44, %v2822_v11  ;;  %3767 = vst.msk [vmem:[%s4930_s15 + $0x188] sm:$0xff] %vm4519_vm2, %v3828_v53  ;;  %v2814_v55 = vadd.f32 %v2813_v38, %v2640_v6 }
 0x270   : > { %3773 = vst.msk [vmem:[%s4930_s15 + $0x1b8] sm:$0xff] %vm4519_vm2, %v3834_v49  ;;  %v3830_v58 = vpack.c.bf16 %v2814_v55, %v2812_v54 }
 0x272   : > { %3769 = vst.msk [vmem:[%s4930_s15 + $0x198] sm:$0xff] %vm4519_vm2, %v3830_v58 }
 0x273   : > { %4258 = shalt.err (!%p4255_p0)
}
 0x274   : > { %s4259_s3 = scalar_lea.hbm %s5053_s20, 7168  ;;  %s4263_s6 = scalar_lea.hbm %s5103_s2, 14336 }
 0x275   : > { %p4260_p5 = scmp.ne.s32.totalorder %s5053_s20, %s4259_s3  ;;  %p4264_p4 = scmp.lt.s32.totalorder %s5053_s20, %s5103_s2 }
 0x276   : > { %p4265_p6 = scmp.lt.s32.totalorder %s4263_s6, %s4259_s3 }
 0x277   : > { %p4261_p9 = pnand %p4260_p5, %p5170_p11 }
 0x278   : > { %p4266_p8 = por %p4265_p6, %p4264_p4 }
 0x279   : > { %p4262_p1 = pneg %p4261_p9 }
 0x27b   : > { %p4267_p3 = pnand %p4266_p8, %p4262_p1 }
 0x27d   : > { %4270 = shalt.err (!%p4267_p3)
}
 0x27e   : > { %s4322_s23 = smov 256   ;;  %s4323_s24 = smov 16  }
 0x27f   : > { %3869 = dma.vmem_to_hbm [thread:$0]  (%p5170_p11), %s5055_s8, 7168, %s5053_s20, %s3220_s13, %s4322_s23, %s4322_s23, %s4323_s24  }
 0x280 PF: > { %s3249_s15 = sand.u32 1, %s4301_s9   ;;  %p5171_p7 = scmp.ne.s32.totalorder %s5126_s16, 0 }
 0x281   : > { %p5172_p12 = scmp.ge.s32.totalorder %s4313_s12, 2  ;;  %s3250_s17 = scalar_lea.sflag [#allocation5], %s3249_s15 }
 0x283   : > { %p3880_p10 = pnand %p5172_p12, %p5171_p7 }
 0x285   : > { %p3881_p2 = pneg %p3880_p10 }
 0x287   : > { %4296 = dma.done.wait (%p3881_p2), %s3250_s17, 7168  }
 0x288   : > { %4298 = vsyncadd (%p3881_p2), %s3250_s17, 4294960128  ;;  %p16_p13 = scmp.ge.s32.totalorder %s4393_s21, 4   ;;  %s5173_s9 = smov %s4305_s10 }
 0x289   : > { %s5174_s10 = smov %s4309_s11  ;;  %s5175_s11 = smov %s4410_s29 }
 0x28a   : > { %s5176_s12 = smov %s4393_s21  ;;  %18 = sbr.rel (!%p16_p13) target bundleno = 6 (0x6), region = 79 }
 0x28f   :  { %3255 = vsyncpa [#allocation4], 1 }
 0x290   :  { %3257 = vsyncpa [#allocation4 + $0x1], 1 }
 0x291   :  { %3258 = vsyncpa [#allocation7], 1 }
 0x292   :  { %3259 = vsyncpa [#allocation5], 1 }
 0x293   :  { %3261 = vsyncpa [#allocation5 + $0x1], 1 }

</bundles_post_ra>
